<compile_context>
chip_gen: v6e
topology: v6e:2x2x1
jax: 0.10.0
libtpu: 0.0.40
codegen_flags: <defaults>
</compile_context>

<pallas_src>
import functools

import jax
import jax.numpy as jnp
import numpy as np
from jax.experimental import pallas as pl
from jax.experimental.pallas import tpu as pltpu


# ----------------------------- fused kernel --------------------------------

def _fused_regressor_kernel(*refs, seq, batch, hidden, n_layers, bidir,
                            pool_k):
    f32 = jnp.float32
    per_layer = 6 if bidir else 3
    n_lstm = per_layer * n_layers
    hd = hidden * (2 if bidir else 1)

    x_ref, ffp_w_ref, ffp_b_ref = refs[0:3]
    lstm_refs = refs[3:3 + n_lstm]
    (ff1_w_ref, ff1_b_ref, ff2_w_ref, ff2_b_ref,
     out_w_ref, out_b_ref, o_ref, act_ref, pool_ref) = refs[3 + n_lstm:]

    def run_direction(gates, w_hh, reverse, lane_off):
        # `gates` already holds x_t @ W_ih + b for every time step (hoisted).
        h = jnp.zeros((batch, hidden), f32)
        c = jnp.zeros((batch, hidden), f32)
        order = range(seq - 1, -1, -1) if reverse else range(seq)
        for t in order:                                  # fully unrolled
            g = gates[t * batch:(t + 1) * batch, :] + jnp.dot(
                h, w_hh, preferred_element_type=f32)     # (B, 4H)
            sig = jax.nn.sigmoid(g)                      # whole-vreg EUP op
            th = jnp.tanh(g)                             # whole-vreg EUP op
            i_g = sig[:, 0 * hidden:1 * hidden]
            f_g = sig[:, 1 * hidden:2 * hidden]
            g_g = th[:, 2 * hidden:3 * hidden]
            o_g = sig[:, 3 * hidden:4 * hidden]
            c = f_g * c + i_g * g_g
            h = o_g * jnp.tanh(c)
            act_ref[pl.ds(t * batch, batch), pl.ds(lane_off, hidden)] = h

    # ff_projection on all seq*batch rows at once.
    act_in = (jnp.dot(x_ref[...], ffp_w_ref[...], preferred_element_type=f32)
              + ffp_b_ref[...])                          # (S*B, H)

    # LSTM stack (PyTorch gate order i, f, g, o; b = b_ih + b_hh).
    for l in range(n_layers):
        base = l * per_layer
        w_ih_f = lstm_refs[base + 0][...]
        w_hh_f = lstm_refs[base + 1][...]
        b_f = lstm_refs[base + 2][...]
        # Hoisted input projection: one matmul for all time steps.
        gates_f = jnp.dot(act_in, w_ih_f, preferred_element_type=f32) + b_f
        if bidir:
            w_ih_b = lstm_refs[base + 3][...]
            w_hh_b = lstm_refs[base + 4][...]
            b_b = lstm_refs[base + 5][...]
            gates_b = jnp.dot(act_in, w_ih_b, preferred_element_type=f32) + b_b
        run_direction(gates_f, w_hh_f, reverse=False, lane_off=0)
        if bidir:
            run_direction(gates_b, w_hh_b, reverse=True, lane_off=hidden)
        # Next layer's input = this layer's full time-major output.
        act_in = act_ref[...]                            # (S*B, hd)
        # nn.LSTM inter-layer dropout is inactive at inference -> identity.

    # MaxPool2d(pool_k) over (seq, feature), kept lane-dense.
    groups = seq // pool_k
    for p in range(groups):                              # time pooling
        m = act_ref[pl.ds(p * pool_k * batch, batch), :]
        for q in range(1, pool_k):
            m = jnp.maximum(
                m, act_ref[pl.ds((p * pool_k + q) * batch, batch), :])
        pool_ref[:, pl.ds(p * hd, hd)] = m
    T = pool_ref[...]                                    # (B, groups*hd)
    L = groups * hd
    width = L - pool_k + 1
    M = T[:, 0:width]                                    # feature pooling via
    for q in range(1, pool_k):                           # shifted-slice maxes
        M = jnp.maximum(M, T[:, q:q + width])
    # ff1 weight was expanded on the host so only window-aligned lanes
    # (p*hd + pool_k*fo) hit nonzero rows; other lanes multiply zeros.
    z = jnp.dot(M, ff1_w_ref[...], preferred_element_type=f32) + ff1_b_ref[...]
    z = jnp.maximum(z, 0.0)
    # TODO(synk): nn.Dropout is identity at inference (drop=0.0 here); no RNG mask applied.
    z = jnp.dot(z, ff2_w_ref[...], preferred_element_type=f32) + ff2_b_ref[...]
    z = jnp.maximum(z, 0.0)
    z = jnp.dot(z, out_w_ref[...], preferred_element_type=f32) + out_b_ref[...]
    o_ref[...] = z.astype(o_ref.dtype)


# ----------------------------- host wrapper --------------------------------

def _expand_ff1_weight(ff1_w, seq, hd, pool_k):
    """Scatter ff1 rows so the kernel's lane-dense pooled activation (garbage
    at non-window-aligned lanes) can be matmul'ed directly:
    row p*hd + pool_k*fo  <-  ff1_w[p*(hd//pool_k) + fo];  all other rows 0.
    Assumes seq % pool_k == 0 and hd % pool_k == 0 (true for this config)."""
    groups = seq // pool_k
    feats = hd // pool_k
    n_out = ff1_w.shape[1]
    w = ff1_w.reshape(groups, feats, n_out)
    w1e = jnp.zeros((groups, hd, n_out), ff1_w.dtype)
    w1e = w1e.at[:, ::pool_k, :].set(w)
    return w1e.reshape(groups * hd, n_out)[: groups * hd - pool_k + 1]


def regressor_forward(x, params, *, hidden, n_layers, bidir, pool_k):
    b, s, in_feat = x.shape
    x = x.astype(jnp.float32)
    d = 2 if bidir else 1
    hd = hidden * d

    # Time-major flattening (row = t*B + b) so the recurrence slices
    # contiguous row blocks per step.
    x_tm = jnp.transpose(x, (1, 0, 2)).reshape(s * b, in_feat)
    ff1_w_exp = _expand_ff1_weight(params["ff1_w"], s, hd, pool_k)

    inputs = [x_tm, params["ffp_w"], params["ffp_b"]]
    for l in range(n_layers):
        p = params["lstm"][l]
        inputs += [p["w_ih_f"], p["w_hh_f"], p["b_f"]]
        if bidir:
            inputs += [p["w_ih_b"], p["w_hh_b"], p["b_b"]]
    inputs += [ff1_w_exp, params["ff1_b"], params["ff2_w"], params["ff2_b"],
               params["out_w"], params["out_b"]]

    kernel = functools.partial(
        _fused_regressor_kernel, seq=s, batch=b, hidden=hidden,
        n_layers=n_layers, bidir=bidir, pool_k=pool_k)

    return pl.pallas_call(
        kernel,
        out_shape=jax.ShapeDtypeStruct((b, 2), jnp.float32),
        grid=(1,),
        in_specs=[pl.BlockSpec(a.shape, lambda i: (0, 0)) for a in inputs],
        out_specs=pl.BlockSpec((b, 2), lambda i: (0, 0)),
        scratch_shapes=[
            pltpu.VMEM((s * b, hd), jnp.float32),            # LSTM outputs
            pltpu.VMEM((b, (s // pool_k) * hd), jnp.float32),  # time-pooled
        ],
        compiler_params=pltpu.CompilerParams(
            dimension_semantics=("arbitrary",)),
    )(*inputs)


# ------------------------------ reference ----------------------------------

def _reference_forward(x, params, *, hidden, n_layers, bidir, pool_k):
    """Pure-JAX reference with identical semantics (for correctness check)."""
    b, s, _ = x.shape
    y = x.astype(jnp.float32) @ params["ffp_w"] + params["ffp_b"]

    def run(y_in, w_ih, w_hh, bias, reverse):
        hh = jnp.zeros((b, hidden), jnp.float32)
        cc = jnp.zeros((b, hidden), jnp.float32)
        outs = [None] * s
        order = range(s - 1, -1, -1) if reverse else range(s)
        for t in order:
            g = y_in[:, t, :] @ w_ih + hh @ w_hh + bias
            i_g = jax.nn.sigmoid(g[:, :hidden])
            f_g = jax.nn.sigmoid(g[:, hidden:2 * hidden])
            g_g = jnp.tanh(g[:, 2 * hidden:3 * hidden])
            o_g = jax.nn.sigmoid(g[:, 3 * hidden:])
            cc = f_g * cc + i_g * g_g
            hh = o_g * jnp.tanh(cc)
            outs[t] = hh
        return jnp.stack(outs, axis=1)

    for l in range(n_layers):
        p = params["lstm"][l]
        fwd = run(y, p["w_ih_f"], p["w_hh_f"], p["b_f"], False)
        if bidir:
            bwd = run(y, p["w_ih_b"], p["w_hh_b"], p["b_b"], True)
            y = jnp.concatenate([fwd, bwd], axis=-1)
        else:
            y = fwd

    hd = y.shape[-1]
    so, fo = s // pool_k, hd // pool_k
    pooled = (y[:, :so * pool_k, :fo * pool_k]
              .reshape(b, so, pool_k, fo, pool_k).max(axis=(2, 4)))
    flat = pooled.reshape(b, -1)
    z = jnp.maximum(flat @ params["ff1_w"] + params["ff1_b"], 0.0)
    z = jnp.maximum(z @ params["ff2_w"] + params["ff2_b"], 0.0)
    return z @ params["out_w"] + params["out_b"]


# ------------------------------ parameters ---------------------------------

def init_params(key, seqlen, hidden, n_layers, bidir, pool_k):
    d = 2 if bidir else 1
    keys = iter(jax.random.split(key, 64))

    def w(shape, scale=0.1):
        return scale * jax.random.normal(next(keys), shape, dtype=jnp.float32)

    params = {"ffp_w": w((2, hidden)), "ffp_b": w((1, hidden)), "lstm": []}
    for l in range(n_layers):
        in_dim = hidden if l == 0 else hidden * d
        layer = {
            "w_ih_f": w((in_dim, 4 * hidden)),
            "w_hh_f": w((hidden, 4 * hidden)),
            "b_f": w((1, 4 * hidden)),        # b_ih + b_hh folded together
        }
        if bidir:
            layer.update({
                "w_ih_b": w((in_dim, 4 * hidden)),
                "w_hh_b": w((hidden, 4 * hidden)),
                "b_b": w((1, 4 * hidden)),
            })
        params["lstm"].append(layer)

    ff1_in = (seqlen // pool_k) * ((hidden * d) // pool_k)
    params["ff1_w"] = w((ff1_in, 512)); params["ff1_b"] = w((1, 512))
    params["ff2_w"] = w((512, 64));     params["ff2_b"] = w((1, 64))
    params["out_w"] = w((64, 2));       params["out_b"] = w((1, 2))
    return params


# --------------------------------- main -------------------------------------

if __name__ == "__main__":
    # Module config: seqlen=8, hidden_dim=32, n_layers=2, drop=0.0,
    # bidir=False, pooling_kernel_size=2.
    batch, seqlen, hidden = 2, 8, 32
    n_layers, bidir, pool_k = 2, False, 2

    key = jax.random.PRNGKey(0)
    kx, kp = jax.random.split(key)
    x = jax.random.normal(kx, (batch, seqlen, 2), dtype=jnp.float32)
    params = init_params(kp, seqlen, hidden, n_layers, bidir, pool_k)

    fwd = jax.jit(functools.partial(regressor_forward, hidden=hidden,
                                    n_layers=n_layers, bidir=bidir,
                                    pool_k=pool_k))
    out = fwd(x, params)
    jax.block_until_ready(out)
    assert out.shape == (batch, 2) and out.dtype == jnp.float32

    ref = _reference_forward(x, params, hidden=hidden, n_layers=n_layers,
                             bidir=bidir, pool_k=pool_k)
    np.testing.assert_allclose(np.asarray(out), np.asarray(ref),
                               rtol=5e-3, atol=5e-3)
    print("KERNEL_OK")
</pallas_src>

<mosaic_0001>
module attributes {stable_mosaic.version = 11 : i64} {
  func.func @_fused_regressor_kernel(%arg0: i32, %arg1: memref<16x2xf32, #tpu.memory_space<vmem>>, %arg2: memref<2x32xf32, #tpu.memory_space<vmem>>, %arg3: memref<1x32xf32, #tpu.memory_space<vmem>>, %arg4: memref<32x128xf32, #tpu.memory_space<vmem>>, %arg5: memref<32x128xf32, #tpu.memory_space<vmem>>, %arg6: memref<1x128xf32, #tpu.memory_space<vmem>>, %arg7: memref<32x128xf32, #tpu.memory_space<vmem>>, %arg8: memref<32x128xf32, #tpu.memory_space<vmem>>, %arg9: memref<1x128xf32, #tpu.memory_space<vmem>>, %arg10: memref<127x512xf32, #tpu.memory_space<vmem>>, %arg11: memref<1x512xf32, #tpu.memory_space<vmem>>, %arg12: memref<512x64xf32, #tpu.memory_space<vmem>>, %arg13: memref<1x64xf32, #tpu.memory_space<vmem>>, %arg14: memref<64x2xf32, #tpu.memory_space<vmem>>, %arg15: memref<1x2xf32, #tpu.memory_space<vmem>>, %arg16: memref<2x2xf32, #tpu.memory_space<vmem>>, %arg17: memref<16x32xf32, #tpu.memory_space<vmem>>, %arg18: memref<2x128xf32, #tpu.memory_space<vmem>>) attributes {dimension_semantics = [#tpu.dimension_semantics<arbitrary>], iteration_bounds = array<i64: 1>, scalar_prefetch = 0 : i64, scratch_operands = 2 : i64, tpu.core_type = #tpu.core_type<tc>, window_params = [{pipeline_mode = #tpu.pipeline_mode<synchronous>, transform_indices = @transform_0, window_bounds = array<i64: 16, 2>}, {pipeline_mode = #tpu.pipeline_mode<synchronous>, transform_indices = @transform_1, window_bounds = array<i64: 2, 32>}, {pipeline_mode = #tpu.pipeline_mode<synchronous>, transform_indices = @transform_2, window_bounds = array<i64: 1, 32>}, {pipeline_mode = #tpu.pipeline_mode<synchronous>, transform_indices = @transform_3, window_bounds = array<i64: 32, 128>}, {pipeline_mode = #tpu.pipeline_mode<synchronous>, transform_indices = @transform_4, window_bounds = array<i64: 32, 128>}, {pipeline_mode = #tpu.pipeline_mode<synchronous>, transform_indices = @transform_5, window_bounds = array<i64: 1, 128>}, {pipeline_mode = #tpu.pipeline_mode<synchronous>, transform_indices = @transform_6, window_bounds = array<i64: 32, 128>}, {pipeline_mode = #tpu.pipeline_mode<synchronous>, transform_indices = @transform_7, window_bounds = array<i64: 32, 128>}, {pipeline_mode = #tpu.pipeline_mode<synchronous>, transform_indices = @transform_8, window_bounds = array<i64: 1, 128>}, {pipeline_mode = #tpu.pipeline_mode<synchronous>, transform_indices = @transform_9, window_bounds = array<i64: 127, 512>}, {pipeline_mode = #tpu.pipeline_mode<synchronous>, transform_indices = @transform_10, window_bounds = array<i64: 1, 512>}, {pipeline_mode = #tpu.pipeline_mode<synchronous>, transform_indices = @transform_11, window_bounds = array<i64: 512, 64>}, {pipeline_mode = #tpu.pipeline_mode<synchronous>, transform_indices = @transform_12, window_bounds = array<i64: 1, 64>}, {pipeline_mode = #tpu.pipeline_mode<synchronous>, transform_indices = @transform_13, window_bounds = array<i64: 64, 2>}, {pipeline_mode = #tpu.pipeline_mode<synchronous>, transform_indices = @transform_14, window_bounds = array<i64: 1, 2>}, {pipeline_mode = #tpu.pipeline_mode<synchronous>, transform_indices = @transform_15, window_bounds = array<i64: 2, 2>}]} {
    %c0 = arith.constant 0 : index
    %c0_0 = arith.constant 0 : index
    %0 = vector.load %arg1[%c0, %c0_0] : memref<16x2xf32, #tpu.memory_space<vmem>>, vector<16x2xf32>
    %c0_1 = arith.constant 0 : index
    %c0_2 = arith.constant 0 : index
    %1 = vector.load %arg2[%c0_1, %c0_2] : memref<2x32xf32, #tpu.memory_space<vmem>>, vector<2x32xf32>
    %cst = arith.constant dense<0.000000e+00> : vector<16x32xf32>
    %2 = tpu.matmul %0, %1, %cst {dimension_numbers = #tpu.dot_dimension_numbers<[1], [0], [0], [1], [0, 0, 1, 1], [], []>} : vector<16x2xf32>, vector<2x32xf32>, vector<16x32xf32> -> vector<16x32xf32>
    %c0_3 = arith.constant 0 : index
    %c0_4 = arith.constant 0 : index
    %3 = vector.load %arg3[%c0_3, %c0_4] : memref<1x32xf32, #tpu.memory_space<vmem>>, vector<1x32xf32>
    %4 = vector.broadcast %3 : vector<1x32xf32> to vector<16x32xf32>
    %5 = arith.addf %2, %4 : vector<16x32xf32>
    %c0_5 = arith.constant 0 : index
    %c0_6 = arith.constant 0 : index
    %6 = vector.load %arg4[%c0_5, %c0_6] : memref<32x128xf32, #tpu.memory_space<vmem>>, vector<32x128xf32>
    %c0_7 = arith.constant 0 : index
    %c0_8 = arith.constant 0 : index
    %7 = vector.load %arg5[%c0_7, %c0_8] : memref<32x128xf32, #tpu.memory_space<vmem>>, vector<32x128xf32>
    %c0_9 = arith.constant 0 : index
    %c0_10 = arith.constant 0 : index
    %8 = vector.load %arg6[%c0_9, %c0_10] : memref<1x128xf32, #tpu.memory_space<vmem>>, vector<1x128xf32>
    %cst_11 = arith.constant dense<0.000000e+00> : vector<16x128xf32>
    %9 = tpu.matmul %5, %6, %cst_11 {dimension_numbers = #tpu.dot_dimension_numbers<[1], [0], [0], [1], [0, 0, 1, 1], [], []>} : vector<16x32xf32>, vector<32x128xf32>, vector<16x128xf32> -> vector<16x128xf32>
    %10 = vector.broadcast %8 : vector<1x128xf32> to vector<16x128xf32>
    %11 = arith.addf %9, %10 : vector<16x128xf32>
    %cst_12 = arith.constant 0.000000e+00 : f32
    %12 = vector.broadcast %cst_12 : f32 to vector<2x32xf32>
    %cst_13 = arith.constant 0.000000e+00 : f32
    %13 = vector.broadcast %cst_13 : f32 to vector<2x32xf32>
    %14 = vector.extract_strided_slice %11 {offsets = [0, 0], sizes = [2, 128], strides = [1, 1]} : vector<16x128xf32> to vector<2x128xf32>
    %cst_14 = arith.constant dense<0.000000e+00> : vector<2x128xf32>
    %15 = tpu.matmul %12, %7, %cst_14 {dimension_numbers = #tpu.dot_dimension_numbers<[1], [0], [0], [1], [0, 0, 1, 1], [], []>} : vector<2x32xf32>, vector<32x128xf32>, vector<2x128xf32> -> vector<2x128xf32>
    %16 = arith.addf %14, %15 : vector<2x128xf32>
    %17 = arith.negf %16 : vector<2x128xf32>
    %18 = math.exp %17 : vector<2x128xf32>
    %cst_15 = arith.constant 1.000000e+00 : f32
    %19 = vector.broadcast %cst_15 : f32 to vector<2x128xf32>
    %20 = arith.addf %19, %18 : vector<2x128xf32>
    %21 = arith.divf %19, %20 : vector<2x128xf32>
    %22 = math.tanh %16 : vector<2x128xf32>
    %23 = vector.extract_strided_slice %21 {offsets = [0, 0], sizes = [2, 32], strides = [1, 1]} : vector<2x128xf32> to vector<2x32xf32>
    %24 = vector.extract_strided_slice %21 {offsets = [0, 32], sizes = [2, 32], strides = [1, 1]} : vector<2x128xf32> to vector<2x32xf32>
    %25 = vector.extract_strided_slice %22 {offsets = [0, 64], sizes = [2, 32], strides = [1, 1]} : vector<2x128xf32> to vector<2x32xf32>
    %26 = vector.extract_strided_slice %21 {offsets = [0, 96], sizes = [2, 32], strides = [1, 1]} : vector<2x128xf32> to vector<2x32xf32>
    %27 = arith.mulf %24, %13 : vector<2x32xf32>
    %28 = arith.mulf %23, %25 : vector<2x32xf32>
    %29 = arith.addf %27, %28 : vector<2x32xf32>
    %30 = math.tanh %29 : vector<2x32xf32>
    %31 = arith.mulf %26, %30 : vector<2x32xf32>
    %c0_16 = arith.constant 0 : index
    %c0_17 = arith.constant 0 : index
    %32 = vector.load %arg17[%c0_16, %c0_17] : memref<16x32xf32, #tpu.memory_space<vmem>>, vector<2x32xf32>
    tpu.vector_store %arg17[%c0_16, %c0_17], %31 {strides = array<i32>} : memref<16x32xf32, #tpu.memory_space<vmem>>, vector<2x32xf32>,
    %33 = vector.extract_strided_slice %11 {offsets = [2, 0], sizes = [2, 128], strides = [1, 1]} : vector<16x128xf32> to vector<2x128xf32>
    %cst_18 = arith.constant dense<0.000000e+00> : vector<2x128xf32>
    %34 = tpu.matmul %31, %7, %cst_18 {dimension_numbers = #tpu.dot_dimension_numbers<[1], [0], [0], [1], [0, 0, 1, 1], [], []>} : vector<2x32xf32>, vector<32x128xf32>, vector<2x128xf32> -> vector<2x128xf32>
    %35 = arith.addf %33, %34 : vector<2x128xf32>
    %36 = arith.negf %35 : vector<2x128xf32>
    %37 = math.exp %36 : vector<2x128xf32>
    %cst_19 = arith.constant 1.000000e+00 : f32
    %38 = vector.broadcast %cst_19 : f32 to vector<2x128xf32>
    %39 = arith.addf %38, %37 : vector<2x128xf32>
    %40 = arith.divf %38, %39 : vector<2x128xf32>
    %41 = math.tanh %35 : vector<2x128xf32>
    %42 = vector.extract_strided_slice %40 {offsets = [0, 0], sizes = [2, 32], strides = [1, 1]} : vector<2x128xf32> to vector<2x32xf32>
    %43 = vector.extract_strided_slice %40 {offsets = [0, 32], sizes = [2, 32], strides = [1, 1]} : vector<2x128xf32> to vector<2x32xf32>
    %44 = vector.extract_strided_slice %41 {offsets = [0, 64], sizes = [2, 32], strides = [1, 1]} : vector<2x128xf32> to vector<2x32xf32>
    %45 = vector.extract_strided_slice %40 {offsets = [0, 96], sizes = [2, 32], strides = [1, 1]} : vector<2x128xf32> to vector<2x32xf32>
    %46 = arith.mulf %43, %29 : vector<2x32xf32>
    %47 = arith.mulf %42, %44 : vector<2x32xf32>
    %48 = arith.addf %46, %47 : vector<2x32xf32>
    %49 = math.tanh %48 : vector<2x32xf32>
    %50 = arith.mulf %45, %49 : vector<2x32xf32>
    %c2 = arith.constant 2 : index
    %c0_20 = arith.constant 0 : index
    %51 = vector.load %arg17[%c2, %c0_20] : memref<16x32xf32, #tpu.memory_space<vmem>>, vector<2x32xf32>
    tpu.vector_store %arg17[%c2, %c0_20], %50 {strides = array<i32>} : memref<16x32xf32, #tpu.memory_space<vmem>>, vector<2x32xf32>,
    %52 = vector.extract_strided_slice %11 {offsets = [4, 0], sizes = [2, 128], strides = [1, 1]} : vector<16x128xf32> to vector<2x128xf32>
    %cst_21 = arith.constant dense<0.000000e+00> : vector<2x128xf32>
    %53 = tpu.matmul %50, %7, %cst_21 {dimension_numbers = #tpu.dot_dimension_numbers<[1], [0], [0], [1], [0, 0, 1, 1], [], []>} : vector<2x32xf32>, vector<32x128xf32>, vector<2x128xf32> -> vector<2x128xf32>
    %54 = arith.addf %52, %53 : vector<2x128xf32>
    %55 = arith.negf %54 : vector<2x128xf32>
    %56 = math.exp %55 : vector<2x128xf32>
    %cst_22 = arith.constant 1.000000e+00 : f32
    %57 = vector.broadcast %cst_22 : f32 to vector<2x128xf32>
    %58 = arith.addf %57, %56 : vector<2x128xf32>
    %59 = arith.divf %57, %58 : vector<2x128xf32>
    %60 = math.tanh %54 : vector<2x128xf32>
    %61 = vector.extract_strided_slice %59 {offsets = [0, 0], sizes = [2, 32], strides = [1, 1]} : vector<2x128xf32> to vector<2x32xf32>
    %62 = vector.extract_strided_slice %59 {offsets = [0, 32], sizes = [2, 32], strides = [1, 1]} : vector<2x128xf32> to vector<2x32xf32>
    %63 = vector.extract_strided_slice %60 {offsets = [0, 64], sizes = [2, 32], strides = [1, 1]} : vector<2x128xf32> to vector<2x32xf32>
    %64 = vector.extract_strided_slice %59 {offsets = [0, 96], sizes = [2, 32], strides = [1, 1]} : vector<2x128xf32> to vector<2x32xf32>
    %65 = arith.mulf %62, %48 : vector<2x32xf32>
    %66 = arith.mulf %61, %63 : vector<2x32xf32>
    %67 = arith.addf %65, %66 : vector<2x32xf32>
    %68 = math.tanh %67 : vector<2x32xf32>
    %69 = arith.mulf %64, %68 : vector<2x32xf32>
    %c4 = arith.constant 4 : index
    %c0_23 = arith.constant 0 : index
    %70 = vector.load %arg17[%c4, %c0_23] : memref<16x32xf32, #tpu.memory_space<vmem>>, vector<2x32xf32>
    tpu.vector_store %arg17[%c4, %c0_23], %69 {strides = array<i32>} : memref<16x32xf32, #tpu.memory_space<vmem>>, vector<2x32xf32>,
    %71 = vector.extract_strided_slice %11 {offsets = [6, 0], sizes = [2, 128], strides = [1, 1]} : vector<16x128xf32> to vector<2x128xf32>
    %cst_24 = arith.constant dense<0.000000e+00> : vector<2x128xf32>
    %72 = tpu.matmul %69, %7, %cst_24 {dimension_numbers = #tpu.dot_dimension_numbers<[1], [0], [0], [1], [0, 0, 1, 1], [], []>} : vector<2x32xf32>, vector<32x128xf32>, vector<2x128xf32> -> vector<2x128xf32>
    %73 = arith.addf %71, %72 : vector<2x128xf32>
    %74 = arith.negf %73 : vector<2x128xf32>
    %75 = math.exp %74 : vector<2x128xf32>
    %cst_25 = arith.constant 1.000000e+00 : f32
    %76 = vector.broadcast %cst_25 : f32 to vector<2x128xf32>
    %77 = arith.addf %76, %75 : vector<2x128xf32>
    %78 = arith.divf %76, %77 : vector<2x128xf32>
    %79 = math.tanh %73 : vector<2x128xf32>
    %80 = vector.extract_strided_slice %78 {offsets = [0, 0], sizes = [2, 32], strides = [1, 1]} : vector<2x128xf32> to vector<2x32xf32>
    %81 = vector.extract_strided_slice %78 {offsets = [0, 32], sizes = [2, 32], strides = [1, 1]} : vector<2x128xf32> to vector<2x32xf32>
    %82 = vector.extract_strided_slice %79 {offsets = [0, 64], sizes = [2, 32], strides = [1, 1]} : vector<2x128xf32> to vector<2x32xf32>
    %83 = vector.extract_strided_slice %78 {offsets = [0, 96], sizes = [2, 32], strides = [1, 1]} : vector<2x128xf32> to vector<2x32xf32>
    %84 = arith.mulf %81, %67 : vector<2x32xf32>
    %85 = arith.mulf %80, %82 : vector<2x32xf32>
    %86 = arith.addf %84, %85 : vector<2x32xf32>
    %87 = math.tanh %86 : vector<2x32xf32>
    %88 = arith.mulf %83, %87 : vector<2x32xf32>
    %c6 = arith.constant 6 : index
    %c0_26 = arith.constant 0 : index
    %89 = vector.load %arg17[%c6, %c0_26] : memref<16x32xf32, #tpu.memory_space<vmem>>, vector<2x32xf32>
    tpu.vector_store %arg17[%c6, %c0_26], %88 {strides = array<i32>} : memref<16x32xf32, #tpu.memory_space<vmem>>, vector<2x32xf32>,
    %90 = vector.extract_strided_slice %11 {offsets = [8, 0], sizes = [2, 128], strides = [1, 1]} : vector<16x128xf32> to vector<2x128xf32>
    %cst_27 = arith.constant dense<0.000000e+00> : vector<2x128xf32>
    %91 = tpu.matmul %88, %7, %cst_27 {dimension_numbers = #tpu.dot_dimension_numbers<[1], [0], [0], [1], [0, 0, 1, 1], [], []>} : vector<2x32xf32>, vector<32x128xf32>, vector<2x128xf32> -> vector<2x128xf32>
    %92 = arith.addf %90, %91 : vector<2x128xf32>
    %93 = arith.negf %92 : vector<2x128xf32>
    %94 = math.exp %93 : vector<2x128xf32>
    %cst_28 = arith.constant 1.000000e+00 : f32
    %95 = vector.broadcast %cst_28 : f32 to vector<2x128xf32>
    %96 = arith.addf %95, %94 : vector<2x128xf32>
    %97 = arith.divf %95, %96 : vector<2x128xf32>
    %98 = math.tanh %92 : vector<2x128xf32>
    %99 = vector.extract_strided_slice %97 {offsets = [0, 0], sizes = [2, 32], strides = [1, 1]} : vector<2x128xf32> to vector<2x32xf32>
    %100 = vector.extract_strided_slice %97 {offsets = [0, 32], sizes = [2, 32], strides = [1, 1]} : vector<2x128xf32> to vector<2x32xf32>
    %101 = vector.extract_strided_slice %98 {offsets = [0, 64], sizes = [2, 32], strides = [1, 1]} : vector<2x128xf32> to vector<2x32xf32>
    %102 = vector.extract_strided_slice %97 {offsets = [0, 96], sizes = [2, 32], strides = [1, 1]} : vector<2x128xf32> to vector<2x32xf32>
    %103 = arith.mulf %100, %86 : vector<2x32xf32>
    %104 = arith.mulf %99, %101 : vector<2x32xf32>
    %105 = arith.addf %103, %104 : vector<2x32xf32>
    %106 = math.tanh %105 : vector<2x32xf32>
    %107 = arith.mulf %102, %106 : vector<2x32xf32>
    %c8 = arith.constant 8 : index
    %c0_29 = arith.constant 0 : index
    %108 = vector.load %arg17[%c8, %c0_29] : memref<16x32xf32, #tpu.memory_space<vmem>>, vector<2x32xf32>
    tpu.vector_store %arg17[%c8, %c0_29], %107 {strides = array<i32>} : memref<16x32xf32, #tpu.memory_space<vmem>>, vector<2x32xf32>,
    %109 = vector.extract_strided_slice %11 {offsets = [10, 0], sizes = [2, 128], strides = [1, 1]} : vector<16x128xf32> to vector<2x128xf32>
    %cst_30 = arith.constant dense<0.000000e+00> : vector<2x128xf32>
    %110 = tpu.matmul %107, %7, %cst_30 {dimension_numbers = #tpu.dot_dimension_numbers<[1], [0], [0], [1], [0, 0, 1, 1], [], []>} : vector<2x32xf32>, vector<32x128xf32>, vector<2x128xf32> -> vector<2x128xf32>
    %111 = arith.addf %109, %110 : vector<2x128xf32>
    %112 = arith.negf %111 : vector<2x128xf32>
    %113 = math.exp %112 : vector<2x128xf32>
    %cst_31 = arith.constant 1.000000e+00 : f32
    %114 = vector.broadcast %cst_31 : f32 to vector<2x128xf32>
    %115 = arith.addf %114, %113 : vector<2x128xf32>
    %116 = arith.divf %114, %115 : vector<2x128xf32>
    %117 = math.tanh %111 : vector<2x128xf32>
    %118 = vector.extract_strided_slice %116 {offsets = [0, 0], sizes = [2, 32], strides = [1, 1]} : vector<2x128xf32> to vector<2x32xf32>
    %119 = vector.extract_strided_slice %116 {offsets = [0, 32], sizes = [2, 32], strides = [1, 1]} : vector<2x128xf32> to vector<2x32xf32>
    %120 = vector.extract_strided_slice %117 {offsets = [0, 64], sizes = [2, 32], strides = [1, 1]} : vector<2x128xf32> to vector<2x32xf32>
    %121 = vector.extract_strided_slice %116 {offsets = [0, 96], sizes = [2, 32], strides = [1, 1]} : vector<2x128xf32> to vector<2x32xf32>
    %122 = arith.mulf %119, %105 : vector<2x32xf32>
    %123 = arith.mulf %118, %120 : vector<2x32xf32>
    %124 = arith.addf %122, %123 : vector<2x32xf32>
    %125 = math.tanh %124 : vector<2x32xf32>
    %126 = arith.mulf %121, %125 : vector<2x32xf32>
    %c10 = arith.constant 10 : index
    %c0_32 = arith.constant 0 : index
    %127 = vector.load %arg17[%c10, %c0_32] : memref<16x32xf32, #tpu.memory_space<vmem>>, vector<2x32xf32>
    tpu.vector_store %arg17[%c10, %c0_32], %126 {strides = array<i32>} : memref<16x32xf32, #tpu.memory_space<vmem>>, vector<2x32xf32>,
    %128 = vector.extract_strided_slice %11 {offsets = [12, 0], sizes = [2, 128], strides = [1, 1]} : vector<16x128xf32> to vector<2x128xf32>
    %cst_33 = arith.constant dense<0.000000e+00> : vector<2x128xf32>
    %129 = tpu.matmul %126, %7, %cst_33 {dimension_numbers = #tpu.dot_dimension_numbers<[1], [0], [0], [1], [0, 0, 1, 1], [], []>} : vector<2x32xf32>, vector<32x128xf32>, vector<2x128xf32> -> vector<2x128xf32>
    %130 = arith.addf %128, %129 : vector<2x128xf32>
    %131 = arith.negf %130 : vector<2x128xf32>
    %132 = math.exp %131 : vector<2x128xf32>
    %cst_34 = arith.constant 1.000000e+00 : f32
    %133 = vector.broadcast %cst_34 : f32 to vector<2x128xf32>
    %134 = arith.addf %133, %132 : vector<2x128xf32>
    %135 = arith.divf %133, %134 : vector<2x128xf32>
    %136 = math.tanh %130 : vector<2x128xf32>
    %137 = vector.extract_strided_slice %135 {offsets = [0, 0], sizes = [2, 32], strides = [1, 1]} : vector<2x128xf32> to vector<2x32xf32>
    %138 = vector.extract_strided_slice %135 {offsets = [0, 32], sizes = [2, 32], strides = [1, 1]} : vector<2x128xf32> to vector<2x32xf32>
    %139 = vector.extract_strided_slice %136 {offsets = [0, 64], sizes = [2, 32], strides = [1, 1]} : vector<2x128xf32> to vector<2x32xf32>
    %140 = vector.extract_strided_slice %135 {offsets = [0, 96], sizes = [2, 32], strides = [1, 1]} : vector<2x128xf32> to vector<2x32xf32>
    %141 = arith.mulf %138, %124 : vector<2x32xf32>
    %142 = arith.mulf %137, %139 : vector<2x32xf32>
    %143 = arith.addf %141, %142 : vector<2x32xf32>
    %144 = math.tanh %143 : vector<2x32xf32>
    %145 = arith.mulf %140, %144 : vector<2x32xf32>
    %c12 = arith.constant 12 : index
    %c0_35 = arith.constant 0 : index
    %146 = vector.load %arg17[%c12, %c0_35] : memref<16x32xf32, #tpu.memory_space<vmem>>, vector<2x32xf32>
    tpu.vector_store %arg17[%c12, %c0_35], %145 {strides = array<i32>} : memref<16x32xf32, #tpu.memory_space<vmem>>, vector<2x32xf32>,
    %147 = vector.extract_strided_slice %11 {offsets = [14, 0], sizes = [2, 128], strides = [1, 1]} : vector<16x128xf32> to vector<2x128xf32>
    %cst_36 = arith.constant dense<0.000000e+00> : vector<2x128xf32>
    %148 = tpu.matmul %145, %7, %cst_36 {dimension_numbers = #tpu.dot_dimension_numbers<[1], [0], [0], [1], [0, 0, 1, 1], [], []>} : vector<2x32xf32>, vector<32x128xf32>, vector<2x128xf32> -> vector<2x128xf32>
    %149 = arith.addf %147, %148 : vector<2x128xf32>
    %150 = arith.negf %149 : vector<2x128xf32>
    %151 = math.exp %150 : vector<2x128xf32>
    %cst_37 = arith.constant 1.000000e+00 : f32
    %152 = vector.broadcast %cst_37 : f32 to vector<2x128xf32>
    %153 = arith.addf %152, %151 : vector<2x128xf32>
    %154 = arith.divf %152, %153 : vector<2x128xf32>
    %155 = math.tanh %149 : vector<2x128xf32>
    %156 = vector.extract_strided_slice %154 {offsets = [0, 0], sizes = [2, 32], strides = [1, 1]} : vector<2x128xf32> to vector<2x32xf32>
    %157 = vector.extract_strided_slice %154 {offsets = [0, 32], sizes = [2, 32], strides = [1, 1]} : vector<2x128xf32> to vector<2x32xf32>
    %158 = vector.extract_strided_slice %155 {offsets = [0, 64], sizes = [2, 32], strides = [1, 1]} : vector<2x128xf32> to vector<2x32xf32>
    %159 = vector.extract_strided_slice %154 {offsets = [0, 96], sizes = [2, 32], strides = [1, 1]} : vector<2x128xf32> to vector<2x32xf32>
    %160 = arith.mulf %157, %143 : vector<2x32xf32>
    %161 = arith.mulf %156, %158 : vector<2x32xf32>
    %162 = arith.addf %160, %161 : vector<2x32xf32>
    %163 = math.tanh %162 : vector<2x32xf32>
    %164 = arith.mulf %159, %163 : vector<2x32xf32>
    %c14 = arith.constant 14 : index
    %c0_38 = arith.constant 0 : index
    %165 = vector.load %arg17[%c14, %c0_38] : memref<16x32xf32, #tpu.memory_space<vmem>>, vector<2x32xf32>
    tpu.vector_store %arg17[%c14, %c0_38], %164 {strides = array<i32>} : memref<16x32xf32, #tpu.memory_space<vmem>>, vector<2x32xf32>,
    %c0_39 = arith.constant 0 : index
    %c0_40 = arith.constant 0 : index
    %166 = vector.load %arg17[%c0_39, %c0_40] : memref<16x32xf32, #tpu.memory_space<vmem>>, vector<16x32xf32>
    %c0_41 = arith.constant 0 : index
    %c0_42 = arith.constant 0 : index
    %167 = vector.load %arg7[%c0_41, %c0_42] : memref<32x128xf32, #tpu.memory_space<vmem>>, vector<32x128xf32>
    %c0_43 = arith.constant 0 : index
    %c0_44 = arith.constant 0 : index
    %168 = vector.load %arg8[%c0_43, %c0_44] : memref<32x128xf32, #tpu.memory_space<vmem>>, vector<32x128xf32>
    %c0_45 = arith.constant 0 : index
    %c0_46 = arith.constant 0 : index
    %169 = vector.load %arg9[%c0_45, %c0_46] : memref<1x128xf32, #tpu.memory_space<vmem>>, vector<1x128xf32>
    %cst_47 = arith.constant dense<0.000000e+00> : vector<16x128xf32>
    %170 = tpu.matmul %166, %167, %cst_47 {dimension_numbers = #tpu.dot_dimension_numbers<[1], [0], [0], [1], [0, 0, 1, 1], [], []>} : vector<16x32xf32>, vector<32x128xf32>, vector<16x128xf32> -> vector<16x128xf32>
    %171 = vector.broadcast %169 : vector<1x128xf32> to vector<16x128xf32>
    %172 = arith.addf %170, %171 : vector<16x128xf32>
    %cst_48 = arith.constant 0.000000e+00 : f32
    %173 = vector.broadcast %cst_48 : f32 to vector<2x32xf32>
    %cst_49 = arith.constant 0.000000e+00 : f32
    %174 = vector.broadcast %cst_49 : f32 to vector<2x32xf32>
    %175 = vector.extract_strided_slice %172 {offsets = [0, 0], sizes = [2, 128], strides = [1, 1]} : vector<16x128xf32> to vector<2x128xf32>
    %cst_50 = arith.constant dense<0.000000e+00> : vector<2x128xf32>
    %176 = tpu.matmul %173, %168, %cst_50 {dimension_numbers = #tpu.dot_dimension_numbers<[1], [0], [0], [1], [0, 0, 1, 1], [], []>} : vector<2x32xf32>, vector<32x128xf32>, vector<2x128xf32> -> vector<2x128xf32>
    %177 = arith.addf %175, %176 : vector<2x128xf32>
    %178 = arith.negf %177 : vector<2x128xf32>
    %179 = math.exp %178 : vector<2x128xf32>
    %cst_51 = arith.constant 1.000000e+00 : f32
    %180 = vector.broadcast %cst_51 : f32 to vector<2x128xf32>
    %181 = arith.addf %180, %179 : vector<2x128xf32>
    %182 = arith.divf %180, %181 : vector<2x128xf32>
    %183 = math.tanh %177 : vector<2x128xf32>
    %184 = vector.extract_strided_slice %182 {offsets = [0, 0], sizes = [2, 32], strides = [1, 1]} : vector<2x128xf32> to vector<2x32xf32>
    %185 = vector.extract_strided_slice %182 {offsets = [0, 32], sizes = [2, 32], strides = [1, 1]} : vector<2x128xf32> to vector<2x32xf32>
    %186 = vector.extract_strided_slice %183 {offsets = [0, 64], sizes = [2, 32], strides = [1, 1]} : vector<2x128xf32> to vector<2x32xf32>
    %187 = vector.extract_strided_slice %182 {offsets = [0, 96], sizes = [2, 32], strides = [1, 1]} : vector<2x128xf32> to vector<2x32xf32>
    %188 = arith.mulf %185, %174 : vector<2x32xf32>
    %189 = arith.mulf %184, %186 : vector<2x32xf32>
    %190 = arith.addf %188, %189 : vector<2x32xf32>
    %191 = math.tanh %190 : vector<2x32xf32>
    %192 = arith.mulf %187, %191 : vector<2x32xf32>
    %c0_52 = arith.constant 0 : index
    %c0_53 = arith.constant 0 : index
    %193 = vector.load %arg17[%c0_52, %c0_53] : memref<16x32xf32, #tpu.memory_space<vmem>>, vector<2x32xf32>
    tpu.vector_store %arg17[%c0_52, %c0_53], %192 {strides = array<i32>} : memref<16x32xf32, #tpu.memory_space<vmem>>, vector<2x32xf32>,
    %194 = vector.extract_strided_slice %172 {offsets = [2, 0], sizes = [2, 128], strides = [1, 1]} : vector<16x128xf32> to vector<2x128xf32>
    %cst_54 = arith.constant dense<0.000000e+00> : vector<2x128xf32>
    %195 = tpu.matmul %192, %168, %cst_54 {dimension_numbers = #tpu.dot_dimension_numbers<[1], [0], [0], [1], [0, 0, 1, 1], [], []>} : vector<2x32xf32>, vector<32x128xf32>, vector<2x128xf32> -> vector<2x128xf32>
    %196 = arith.addf %194, %195 : vector<2x128xf32>
    %197 = arith.negf %196 : vector<2x128xf32>
    %198 = math.exp %197 : vector<2x128xf32>
    %cst_55 = arith.constant 1.000000e+00 : f32
    %199 = vector.broadcast %cst_55 : f32 to vector<2x128xf32>
    %200 = arith.addf %199, %198 : vector<2x128xf32>
    %201 = arith.divf %199, %200 : vector<2x128xf32>
    %202 = math.tanh %196 : vector<2x128xf32>
    %203 = vector.extract_strided_slice %201 {offsets = [0, 0], sizes = [2, 32], strides = [1, 1]} : vector<2x128xf32> to vector<2x32xf32>
    %204 = vector.extract_strided_slice %201 {offsets = [0, 32], sizes = [2, 32], strides = [1, 1]} : vector<2x128xf32> to vector<2x32xf32>
    %205 = vector.extract_strided_slice %202 {offsets = [0, 64], sizes = [2, 32], strides = [1, 1]} : vector<2x128xf32> to vector<2x32xf32>
    %206 = vector.extract_strided_slice %201 {offsets = [0, 96], sizes = [2, 32], strides = [1, 1]} : vector<2x128xf32> to vector<2x32xf32>
    %207 = arith.mulf %204, %190 : vector<2x32xf32>
    %208 = arith.mulf %203, %205 : vector<2x32xf32>
    %209 = arith.addf %207, %208 : vector<2x32xf32>
    %210 = math.tanh %209 : vector<2x32xf32>
    %211 = arith.mulf %206, %210 : vector<2x32xf32>
    %c2_56 = arith.constant 2 : index
    %c0_57 = arith.constant 0 : index
    %212 = vector.load %arg17[%c2_56, %c0_57] : memref<16x32xf32, #tpu.memory_space<vmem>>, vector<2x32xf32>
    tpu.vector_store %arg17[%c2_56, %c0_57], %211 {strides = array<i32>} : memref<16x32xf32, #tpu.memory_space<vmem>>, vector<2x32xf32>,
    %213 = vector.extract_strided_slice %172 {offsets = [4, 0], sizes = [2, 128], strides = [1, 1]} : vector<16x128xf32> to vector<2x128xf32>
    %cst_58 = arith.constant dense<0.000000e+00> : vector<2x128xf32>
    %214 = tpu.matmul %211, %168, %cst_58 {dimension_numbers = #tpu.dot_dimension_numbers<[1], [0], [0], [1], [0, 0, 1, 1], [], []>} : vector<2x32xf32>, vector<32x128xf32>, vector<2x128xf32> -> vector<2x128xf32>
    %215 = arith.addf %213, %214 : vector<2x128xf32>
    %216 = arith.negf %215 : vector<2x128xf32>
    %217 = math.exp %216 : vector<2x128xf32>
    %cst_59 = arith.constant 1.000000e+00 : f32
    %218 = vector.broadcast %cst_59 : f32 to vector<2x128xf32>
    %219 = arith.addf %218, %217 : vector<2x128xf32>
    %220 = arith.divf %218, %219 : vector<2x128xf32>
    %221 = math.tanh %215 : vector<2x128xf32>
    %222 = vector.extract_strided_slice %220 {offsets = [0, 0], sizes = [2, 32], strides = [1, 1]} : vector<2x128xf32> to vector<2x32xf32>
    %223 = vector.extract_strided_slice %220 {offsets = [0, 32], sizes = [2, 32], strides = [1, 1]} : vector<2x128xf32> to vector<2x32xf32>
    %224 = vector.extract_strided_slice %221 {offsets = [0, 64], sizes = [2, 32], strides = [1, 1]} : vector<2x128xf32> to vector<2x32xf32>
    %225 = vector.extract_strided_slice %220 {offsets = [0, 96], sizes = [2, 32], strides = [1, 1]} : vector<2x128xf32> to vector<2x32xf32>
    %226 = arith.mulf %223, %209 : vector<2x32xf32>
    %227 = arith.mulf %222, %224 : vector<2x32xf32>
    %228 = arith.addf %226, %227 : vector<2x32xf32>
    %229 = math.tanh %228 : vector<2x32xf32>
    %230 = arith.mulf %225, %229 : vector<2x32xf32>
    %c4_60 = arith.constant 4 : index
    %c0_61 = arith.constant 0 : index
    %231 = vector.load %arg17[%c4_60, %c0_61] : memref<16x32xf32, #tpu.memory_space<vmem>>, vector<2x32xf32>
    tpu.vector_store %arg17[%c4_60, %c0_61], %230 {strides = array<i32>} : memref<16x32xf32, #tpu.memory_space<vmem>>, vector<2x32xf32>,
    %232 = vector.extract_strided_slice %172 {offsets = [6, 0], sizes = [2, 128], strides = [1, 1]} : vector<16x128xf32> to vector<2x128xf32>
    %cst_62 = arith.constant dense<0.000000e+00> : vector<2x128xf32>
    %233 = tpu.matmul %230, %168, %cst_62 {dimension_numbers = #tpu.dot_dimension_numbers<[1], [0], [0], [1], [0, 0, 1, 1], [], []>} : vector<2x32xf32>, vector<32x128xf32>, vector<2x128xf32> -> vector<2x128xf32>
    %234 = arith.addf %232, %233 : vector<2x128xf32>
    %235 = arith.negf %234 : vector<2x128xf32>
    %236 = math.exp %235 : vector<2x128xf32>
    %cst_63 = arith.constant 1.000000e+00 : f32
    %237 = vector.broadcast %cst_63 : f32 to vector<2x128xf32>
    %238 = arith.addf %237, %236 : vector<2x128xf32>
    %239 = arith.divf %237, %238 : vector<2x128xf32>
    %240 = math.tanh %234 : vector<2x128xf32>
    %241 = vector.extract_strided_slice %239 {offsets = [0, 0], sizes = [2, 32], strides = [1, 1]} : vector<2x128xf32> to vector<2x32xf32>
    %242 = vector.extract_strided_slice %239 {offsets = [0, 32], sizes = [2, 32], strides = [1, 1]} : vector<2x128xf32> to vector<2x32xf32>
    %243 = vector.extract_strided_slice %240 {offsets = [0, 64], sizes = [2, 32], strides = [1, 1]} : vector<2x128xf32> to vector<2x32xf32>
    %244 = vector.extract_strided_slice %239 {offsets = [0, 96], sizes = [2, 32], strides = [1, 1]} : vector<2x128xf32> to vector<2x32xf32>
    %245 = arith.mulf %242, %228 : vector<2x32xf32>
    %246 = arith.mulf %241, %243 : vector<2x32xf32>
    %247 = arith.addf %245, %246 : vector<2x32xf32>
    %248 = math.tanh %247 : vector<2x32xf32>
    %249 = arith.mulf %244, %248 : vector<2x32xf32>
    %c6_64 = arith.constant 6 : index
    %c0_65 = arith.constant 0 : index
    %250 = vector.load %arg17[%c6_64, %c0_65] : memref<16x32xf32, #tpu.memory_space<vmem>>, vector<2x32xf32>
    tpu.vector_store %arg17[%c6_64, %c0_65], %249 {strides = array<i32>} : memref<16x32xf32, #tpu.memory_space<vmem>>, vector<2x32xf32>,
    %251 = vector.extract_strided_slice %172 {offsets = [8, 0], sizes = [2, 128], strides = [1, 1]} : vector<16x128xf32> to vector<2x128xf32>
    %cst_66 = arith.constant dense<0.000000e+00> : vector<2x128xf32>
    %252 = tpu.matmul %249, %168, %cst_66 {dimension_numbers = #tpu.dot_dimension_numbers<[1], [0], [0], [1], [0, 0, 1, 1], [], []>} : vector<2x32xf32>, vector<32x128xf32>, vector<2x128xf32> -> vector<2x128xf32>
    %253 = arith.addf %251, %252 : vector<2x128xf32>
    %254 = arith.negf %253 : vector<2x128xf32>
    %255 = math.exp %254 : vector<2x128xf32>
    %cst_67 = arith.constant 1.000000e+00 : f32
    %256 = vector.broadcast %cst_67 : f32 to vector<2x128xf32>
    %257 = arith.addf %256, %255 : vector<2x128xf32>
    %258 = arith.divf %256, %257 : vector<2x128xf32>
    %259 = math.tanh %253 : vector<2x128xf32>
    %260 = vector.extract_strided_slice %258 {offsets = [0, 0], sizes = [2, 32], strides = [1, 1]} : vector<2x128xf32> to vector<2x32xf32>
    %261 = vector.extract_strided_slice %258 {offsets = [0, 32], sizes = [2, 32], strides = [1, 1]} : vector<2x128xf32> to vector<2x32xf32>
    %262 = vector.extract_strided_slice %259 {offsets = [0, 64], sizes = [2, 32], strides = [1, 1]} : vector<2x128xf32> to vector<2x32xf32>
    %263 = vector.extract_strided_slice %258 {offsets = [0, 96], sizes = [2, 32], strides = [1, 1]} : vector<2x128xf32> to vector<2x32xf32>
    %264 = arith.mulf %261, %247 : vector<2x32xf32>
    %265 = arith.mulf %260, %262 : vector<2x32xf32>
    %266 = arith.addf %264, %265 : vector<2x32xf32>
    %267 = math.tanh %266 : vector<2x32xf32>
    %268 = arith.mulf %263, %267 : vector<2x32xf32>
    %c8_68 = arith.constant 8 : index
    %c0_69 = arith.constant 0 : index
    %269 = vector.load %arg17[%c8_68, %c0_69] : memref<16x32xf32, #tpu.memory_space<vmem>>, vector<2x32xf32>
    tpu.vector_store %arg17[%c8_68, %c0_69], %268 {strides = array<i32>} : memref<16x32xf32, #tpu.memory_space<vmem>>, vector<2x32xf32>,
    %270 = vector.extract_strided_slice %172 {offsets = [10, 0], sizes = [2, 128], strides = [1, 1]} : vector<16x128xf32> to vector<2x128xf32>
    %cst_70 = arith.constant dense<0.000000e+00> : vector<2x128xf32>
    %271 = tpu.matmul %268, %168, %cst_70 {dimension_numbers = #tpu.dot_dimension_numbers<[1], [0], [0], [1], [0, 0, 1, 1], [], []>} : vector<2x32xf32>, vector<32x128xf32>, vector<2x128xf32> -> vector<2x128xf32>
    %272 = arith.addf %270, %271 : vector<2x128xf32>
    %273 = arith.negf %272 : vector<2x128xf32>
    %274 = math.exp %273 : vector<2x128xf32>
    %cst_71 = arith.constant 1.000000e+00 : f32
    %275 = vector.broadcast %cst_71 : f32 to vector<2x128xf32>
    %276 = arith.addf %275, %274 : vector<2x128xf32>
    %277 = arith.divf %275, %276 : vector<2x128xf32>
    %278 = math.tanh %272 : vector<2x128xf32>
    %279 = vector.extract_strided_slice %277 {offsets = [0, 0], sizes = [2, 32], strides = [1, 1]} : vector<2x128xf32> to vector<2x32xf32>
    %280 = vector.extract_strided_slice %277 {offsets = [0, 32], sizes = [2, 32], strides = [1, 1]} : vector<2x128xf32> to vector<2x32xf32>
    %281 = vector.extract_strided_slice %278 {offsets = [0, 64], sizes = [2, 32], strides = [1, 1]} : vector<2x128xf32> to vector<2x32xf32>
    %282 = vector.extract_strided_slice %277 {offsets = [0, 96], sizes = [2, 32], strides = [1, 1]} : vector<2x128xf32> to vector<2x32xf32>
    %283 = arith.mulf %280, %266 : vector<2x32xf32>
    %284 = arith.mulf %279, %281 : vector<2x32xf32>
    %285 = arith.addf %283, %284 : vector<2x32xf32>
    %286 = math.tanh %285 : vector<2x32xf32>
    %287 = arith.mulf %282, %286 : vector<2x32xf32>
    %c10_72 = arith.constant 10 : index
    %c0_73 = arith.constant 0 : index
    %288 = vector.load %arg17[%c10_72, %c0_73] : memref<16x32xf32, #tpu.memory_space<vmem>>, vector<2x32xf32>
    tpu.vector_store %arg17[%c10_72, %c0_73], %287 {strides = array<i32>} : memref<16x32xf32, #tpu.memory_space<vmem>>, vector<2x32xf32>,
    %289 = vector.extract_strided_slice %172 {offsets = [12, 0], sizes = [2, 128], strides = [1, 1]} : vector<16x128xf32> to vector<2x128xf32>
    %cst_74 = arith.constant dense<0.000000e+00> : vector<2x128xf32>
    %290 = tpu.matmul %287, %168, %cst_74 {dimension_numbers = #tpu.dot_dimension_numbers<[1], [0], [0], [1], [0, 0, 1, 1], [], []>} : vector<2x32xf32>, vector<32x128xf32>, vector<2x128xf32> -> vector<2x128xf32>
    %291 = arith.addf %289, %290 : vector<2x128xf32>
    %292 = arith.negf %291 : vector<2x128xf32>
    %293 = math.exp %292 : vector<2x128xf32>
    %cst_75 = arith.constant 1.000000e+00 : f32
    %294 = vector.broadcast %cst_75 : f32 to vector<2x128xf32>
    %295 = arith.addf %294, %293 : vector<2x128xf32>
    %296 = arith.divf %294, %295 : vector<2x128xf32>
    %297 = math.tanh %291 : vector<2x128xf32>
    %298 = vector.extract_strided_slice %296 {offsets = [0, 0], sizes = [2, 32], strides = [1, 1]} : vector<2x128xf32> to vector<2x32xf32>
    %299 = vector.extract_strided_slice %296 {offsets = [0, 32], sizes = [2, 32], strides = [1, 1]} : vector<2x128xf32> to vector<2x32xf32>
    %300 = vector.extract_strided_slice %297 {offsets = [0, 64], sizes = [2, 32], strides = [1, 1]} : vector<2x128xf32> to vector<2x32xf32>
    %301 = vector.extract_strided_slice %296 {offsets = [0, 96], sizes = [2, 32], strides = [1, 1]} : vector<2x128xf32> to vector<2x32xf32>
    %302 = arith.mulf %299, %285 : vector<2x32xf32>
    %303 = arith.mulf %298, %300 : vector<2x32xf32>
    %304 = arith.addf %302, %303 : vector<2x32xf32>
    %305 = math.tanh %304 : vector<2x32xf32>
    %306 = arith.mulf %301, %305 : vector<2x32xf32>
    %c12_76 = arith.constant 12 : index
    %c0_77 = arith.constant 0 : index
    %307 = vector.load %arg17[%c12_76, %c0_77] : memref<16x32xf32, #tpu.memory_space<vmem>>, vector<2x32xf32>
    tpu.vector_store %arg17[%c12_76, %c0_77], %306 {strides = array<i32>} : memref<16x32xf32, #tpu.memory_space<vmem>>, vector<2x32xf32>,
    %308 = vector.extract_strided_slice %172 {offsets = [14, 0], sizes = [2, 128], strides = [1, 1]} : vector<16x128xf32> to vector<2x128xf32>
    %cst_78 = arith.constant dense<0.000000e+00> : vector<2x128xf32>
    %309 = tpu.matmul %306, %168, %cst_78 {dimension_numbers = #tpu.dot_dimension_numbers<[1], [0], [0], [1], [0, 0, 1, 1], [], []>} : vector<2x32xf32>, vector<32x128xf32>, vector<2x128xf32> -> vector<2x128xf32>
    %310 = arith.addf %308, %309 : vector<2x128xf32>
    %311 = arith.negf %310 : vector<2x128xf32>
    %312 = math.exp %311 : vector<2x128xf32>
    %cst_79 = arith.constant 1.000000e+00 : f32
    %313 = vector.broadcast %cst_79 : f32 to vector<2x128xf32>
    %314 = arith.addf %313, %312 : vector<2x128xf32>
    %315 = arith.divf %313, %314 : vector<2x128xf32>
    %316 = math.tanh %310 : vector<2x128xf32>
    %317 = vector.extract_strided_slice %315 {offsets = [0, 0], sizes = [2, 32], strides = [1, 1]} : vector<2x128xf32> to vector<2x32xf32>
    %318 = vector.extract_strided_slice %315 {offsets = [0, 32], sizes = [2, 32], strides = [1, 1]} : vector<2x128xf32> to vector<2x32xf32>
    %319 = vector.extract_strided_slice %316 {offsets = [0, 64], sizes = [2, 32], strides = [1, 1]} : vector<2x128xf32> to vector<2x32xf32>
    %320 = vector.extract_strided_slice %315 {offsets = [0, 96], sizes = [2, 32], strides = [1, 1]} : vector<2x128xf32> to vector<2x32xf32>
    %321 = arith.mulf %318, %304 : vector<2x32xf32>
    %322 = arith.mulf %317, %319 : vector<2x32xf32>
    %323 = arith.addf %321, %322 : vector<2x32xf32>
    %324 = math.tanh %323 : vector<2x32xf32>
    %325 = arith.mulf %320, %324 : vector<2x32xf32>
    %c14_80 = arith.constant 14 : index
    %c0_81 = arith.constant 0 : index
    %326 = vector.load %arg17[%c14_80, %c0_81] : memref<16x32xf32, #tpu.memory_space<vmem>>, vector<2x32xf32>
    tpu.vector_store %arg17[%c14_80, %c0_81], %325 {strides = array<i32>} : memref<16x32xf32, #tpu.memory_space<vmem>>, vector<2x32xf32>,
    %c0_82 = arith.constant 0 : index
    %c0_83 = arith.constant 0 : index
    %327 = vector.load %arg17[%c0_82, %c0_83] : memref<16x32xf32, #tpu.memory_space<vmem>>, vector<2x32xf32>
    %c2_84 = arith.constant 2 : index
    %c0_85 = arith.constant 0 : index
    %328 = vector.load %arg17[%c2_84, %c0_85] : memref<16x32xf32, #tpu.memory_space<vmem>>, vector<2x32xf32>
    %329 = arith.maximumf %327, %328 : vector<2x32xf32>
    %c0_86 = arith.constant 0 : index
    %c0_87 = arith.constant 0 : index
    %330 = vector.load %arg18[%c0_86, %c0_87] : memref<2x128xf32, #tpu.memory_space<vmem>>, vector<2x32xf32>
    tpu.vector_store %arg18[%c0_86, %c0_87], %329 {strides = array<i32>} : memref<2x128xf32, #tpu.memory_space<vmem>>, vector<2x32xf32>,
    %c4_88 = arith.constant 4 : index
    %c0_89 = arith.constant 0 : index
    %331 = vector.load %arg17[%c4_88, %c0_89] : memref<16x32xf32, #tpu.memory_space<vmem>>, vector<2x32xf32>
    %c6_90 = arith.constant 6 : index
    %c0_91 = arith.constant 0 : index
    %332 = vector.load %arg17[%c6_90, %c0_91] : memref<16x32xf32, #tpu.memory_space<vmem>>, vector<2x32xf32>
    %333 = arith.maximumf %331, %332 : vector<2x32xf32>
    %c0_92 = arith.constant 0 : index
    %c32 = arith.constant 32 : index
    %334 = vector.load %arg18[%c0_92, %c32] : memref<2x128xf32, #tpu.memory_space<vmem>>, vector<2x32xf32>
    tpu.vector_store %arg18[%c0_92, %c32], %333 {strides = array<i32>} : memref<2x128xf32, #tpu.memory_space<vmem>>, vector<2x32xf32>,
    %c8_93 = arith.constant 8 : index
    %c0_94 = arith.constant 0 : index
    %335 = vector.load %arg17[%c8_93, %c0_94] : memref<16x32xf32, #tpu.memory_space<vmem>>, vector<2x32xf32>
    %c10_95 = arith.constant 10 : index
    %c0_96 = arith.constant 0 : index
    %336 = vector.load %arg17[%c10_95, %c0_96] : memref<16x32xf32, #tpu.memory_space<vmem>>, vector<2x32xf32>
    %337 = arith.maximumf %335, %336 : vector<2x32xf32>
    %c0_97 = arith.constant 0 : index
    %c64 = arith.constant 64 : index
    %338 = vector.load %arg18[%c0_97, %c64] : memref<2x128xf32, #tpu.memory_space<vmem>>, vector<2x32xf32>
    tpu.vector_store %arg18[%c0_97, %c64], %337 {strides = array<i32>} : memref<2x128xf32, #tpu.memory_space<vmem>>, vector<2x32xf32>,
    %c12_98 = arith.constant 12 : index
    %c0_99 = arith.constant 0 : index
    %339 = vector.load %arg17[%c12_98, %c0_99] : memref<16x32xf32, #tpu.memory_space<vmem>>, vector<2x32xf32>
    %c14_100 = arith.constant 14 : index
    %c0_101 = arith.constant 0 : index
    %340 = vector.load %arg17[%c14_100, %c0_101] : memref<16x32xf32, #tpu.memory_space<vmem>>, vector<2x32xf32>
    %341 = arith.maximumf %339, %340 : vector<2x32xf32>
    %c0_102 = arith.constant 0 : index
    %c96 = arith.constant 96 : index
    %342 = vector.load %arg18[%c0_102, %c96] : memref<2x128xf32, #tpu.memory_space<vmem>>, vector<2x32xf32>
    tpu.vector_store %arg18[%c0_102, %c96], %341 {strides = array<i32>} : memref<2x128xf32, #tpu.memory_space<vmem>>, vector<2x32xf32>,
    %c0_103 = arith.constant 0 : index
    %c0_104 = arith.constant 0 : index
    %343 = vector.load %arg18[%c0_103, %c0_104] : memref<2x128xf32, #tpu.memory_space<vmem>>, vector<2x128xf32>
    %344 = vector.extract_strided_slice %343 {offsets = [0, 0], sizes = [2, 127], strides = [1, 1]} : vector<2x128xf32> to vector<2x127xf32>
    %345 = vector.extract_strided_slice %343 {offsets = [0, 1], sizes = [2, 127], strides = [1, 1]} : vector<2x128xf32> to vector<2x127xf32>
    %346 = arith.maximumf %344, %345 : vector<2x127xf32>
    %c0_105 = arith.constant 0 : index
    %c0_106 = arith.constant 0 : index
    %347 = vector.load %arg10[%c0_105, %c0_106] : memref<127x512xf32, #tpu.memory_space<vmem>>, vector<127x512xf32>
    %cst_107 = arith.constant dense<0.000000e+00> : vector<2x512xf32>
    %348 = tpu.matmul %346, %347, %cst_107 {dimension_numbers = #tpu.dot_dimension_numbers<[1], [0], [0], [1], [0, 0, 1, 1], [], []>} : vector<2x127xf32>, vector<127x512xf32>, vector<2x512xf32> -> vector<2x512xf32>
    %c0_108 = arith.constant 0 : index
    %c0_109 = arith.constant 0 : index
    %349 = vector.load %arg11[%c0_108, %c0_109] : memref<1x512xf32, #tpu.memory_space<vmem>>, vector<1x512xf32>
    %350 = vector.broadcast %349 : vector<1x512xf32> to vector<2x512xf32>
    %351 = arith.addf %348, %350 : vector<2x512xf32>
    %cst_110 = arith.constant 0.000000e+00 : f32
    %352 = vector.broadcast %cst_110 : f32 to vector<2x512xf32>
    %353 = arith.maximumf %351, %352 : vector<2x512xf32>
    %c0_111 = arith.constant 0 : index
    %c0_112 = arith.constant 0 : index
    %354 = vector.load %arg12[%c0_111, %c0_112] : memref<512x64xf32, #tpu.memory_space<vmem>>, vector<512x64xf32>
    %cst_113 = arith.constant dense<0.000000e+00> : vector<2x64xf32>
    %355 = tpu.matmul %353, %354, %cst_113 {dimension_numbers = #tpu.dot_dimension_numbers<[1], [0], [0], [1], [0, 0, 1, 1], [], []>} : vector<2x512xf32>, vector<512x64xf32>, vector<2x64xf32> -> vector<2x64xf32>
    %c0_114 = arith.constant 0 : index
    %c0_115 = arith.constant 0 : index
    %356 = vector.load %arg13[%c0_114, %c0_115] : memref<1x64xf32, #tpu.memory_space<vmem>>, vector<1x64xf32>
    %357 = vector.broadcast %356 : vector<1x64xf32> to vector<2x64xf32>
    %358 = arith.addf %355, %357 : vector<2x64xf32>
    %cst_116 = arith.constant 0.000000e+00 : f32
    %359 = vector.broadcast %cst_116 : f32 to vector<2x64xf32>
    %360 = arith.maximumf %358, %359 : vector<2x64xf32>
    %c0_117 = arith.constant 0 : index
    %c0_118 = arith.constant 0 : index
    %361 = vector.load %arg14[%c0_117, %c0_118] : memref<64x2xf32, #tpu.memory_space<vmem>>, vector<64x2xf32>
    %cst_119 = arith.constant dense<0.000000e+00> : vector<2x2xf32>
    %362 = tpu.matmul %360, %361, %cst_119 {dimension_numbers = #tpu.dot_dimension_numbers<[1], [0], [0], [1], [0, 0, 1, 1], [], []>} : vector<2x64xf32>, vector<64x2xf32>, vector<2x2xf32> -> vector<2x2xf32>
    %c0_120 = arith.constant 0 : index
    %c0_121 = arith.constant 0 : index
    %363 = vector.load %arg15[%c0_120, %c0_121] : memref<1x2xf32, #tpu.memory_space<vmem>>, vector<1x2xf32>
    %364 = vector.broadcast %363 : vector<1x2xf32> to vector<2x2xf32>
    %365 = arith.addf %362, %364 : vector<2x2xf32>
    %c0_122 = arith.constant 0 : index
    %c0_123 = arith.constant 0 : index
    %366 = vector.load %arg16[%c0_122, %c0_123] : memref<2x2xf32, #tpu.memory_space<vmem>>, vector<2x2xf32>
    tpu.vector_store %arg16[%c0_122, %c0_123], %365 {strides = array<i32>} : memref<2x2xf32, #tpu.memory_space<vmem>>, vector<2x2xf32>,
    return
  }
  func.func @transform_0(%arg0: i32) -> (i32, i32) {
    %c0_i32 = arith.constant 0 : i32
    %c0_i32_0 = arith.constant 0 : i32
    %c0_i32_1 = arith.constant 0 : i32
    return %c0_i32, %c0_i32_0 : i32, i32
  }
  func.func @transform_1(%arg0: i32) -> (i32, i32) {
    %c0_i32 = arith.constant 0 : i32
    %c0_i32_0 = arith.constant 0 : i32
    %c0_i32_1 = arith.constant 0 : i32
    return %c0_i32, %c0_i32_0 : i32, i32
  }
  func.func @transform_2(%arg0: i32) -> (i32, i32) {
    %c0_i32 = arith.constant 0 : i32
    %c0_i32_0 = arith.constant 0 : i32
    %c0_i32_1 = arith.constant 0 : i32
    return %c0_i32, %c0_i32_0 : i32, i32
  }
  func.func @transform_3(%arg0: i32) -> (i32, i32) {
    %c0_i32 = arith.constant 0 : i32
    %c0_i32_0 = arith.constant 0 : i32
    %c0_i32_1 = arith.constant 0 : i32
    return %c0_i32, %c0_i32_0 : i32, i32
  }
  func.func @transform_4(%arg0: i32) -> (i32, i32) {
    %c0_i32 = arith.constant 0 : i32
    %c0_i32_0 = arith.constant 0 : i32
    %c0_i32_1 = arith.constant 0 : i32
    return %c0_i32, %c0_i32_0 : i32, i32
  }
  func.func @transform_5(%arg0: i32) -> (i32, i32) {
    %c0_i32 = arith.constant 0 : i32
    %c0_i32_0 = arith.constant 0 : i32
    %c0_i32_1 = arith.constant 0 : i32
    return %c0_i32, %c0_i32_0 : i32, i32
  }
  func.func @transform_6(%arg0: i32) -> (i32, i32) {
    %c0_i32 = arith.constant 0 : i32
    %c0_i32_0 = arith.constant 0 : i32
    %c0_i32_1 = arith.constant 0 : i32
    return %c0_i32, %c0_i32_0 : i32, i32
  }
  func.func @transform_7(%arg0: i32) -> (i32, i32) {
    %c0_i32 = arith.constant 0 : i32
    %c0_i32_0 = arith.constant 0 : i32
    %c0_i32_1 = arith.constant 0 : i32
    return %c0_i32, %c0_i32_0 : i32, i32
  }
  func.func @transform_8(%arg0: i32) -> (i32, i32) {
    %c0_i32 = arith.constant 0 : i32
    %c0_i32_0 = arith.constant 0 : i32
    %c0_i32_1 = arith.constant 0 : i32
    return %c0_i32, %c0_i32_0 : i32, i32
  }
  func.func @transform_9(%arg0: i32) -> (i32, i32) {
    %c0_i32 = arith.constant 0 : i32
    %c0_i32_0 = arith.constant 0 : i32
    %c0_i32_1 = arith.constant 0 : i32
    return %c0_i32, %c0_i32_0 : i32, i32
  }
  func.func @transform_10(%arg0: i32) -> (i32, i32) {
    %c0_i32 = arith.constant 0 : i32
    %c0_i32_0 = arith.constant 0 : i32
    %c0_i32_1 = arith.constant 0 : i32
    return %c0_i32, %c0_i32_0 : i32, i32
  }
  func.func @transform_11(%arg0: i32) -> (i32, i32) {
    %c0_i32 = arith.constant 0 : i32
    %c0_i32_0 = arith.constant 0 : i32
    %c0_i32_1 = arith.constant 0 : i32
    return %c0_i32, %c0_i32_0 : i32, i32
  }
  func.func @transform_12(%arg0: i32) -> (i32, i32) {
    %c0_i32 = arith.constant 0 : i32
    %c0_i32_0 = arith.constant 0 : i32
    %c0_i32_1 = arith.constant 0 : i32
    return %c0_i32, %c0_i32_0 : i32, i32
  }
  func.func @transform_13(%arg0: i32) -> (i32, i32) {
    %c0_i32 = arith.constant 0 : i32
    %c0_i32_0 = arith.constant 0 : i32
    %c0_i32_1 = arith.constant 0 : i32
    return %c0_i32, %c0_i32_0 : i32, i32
  }
  func.func @transform_14(%arg0: i32) -> (i32, i32) {
    %c0_i32 = arith.constant 0 : i32
    %c0_i32_0 = arith.constant 0 : i32
    %c0_i32_1 = arith.constant 0 : i32
    return %c0_i32, %c0_i32_0 : i32, i32
  }
  func.func @transform_15(%arg0: i32) -> (i32, i32) {
    %c0_i32 = arith.constant 0 : i32
    %c0_i32_0 = arith.constant 0 : i32
    %c0_i32_1 = arith.constant 0 : i32
    return %c0_i32, %c0_i32_0 : i32, i32
  }
}

</mosaic_0001>

<bundles_post_ra>
// kernel: regressor_forward.1
= control target key start
LH: loop header
LB: loop body
LE: loop exit
PB: predicated region body
PF: predicated region fallthrough
CT: control target
= control target key end

     0   :  { %vm68_vm0 = vcmask 1041408   ;;  %vm61_vm1 = vcmask 15360   ;;  %s4217_s0 = inlined_call_operand.vmem [shape: f32[16,2], index: 0, kind: input, shape index: {}]   ;;  %s4218_s1 = inlined_call_operand.vmem [shape: f32[2,32], index: 1, kind: input, shape index: {}]   ;;  %s4219_s2 = inlined_call_operand.vmem [shape: f32[1,32], index: 2, kind: input, shape index: {}]   ;;  %s4220_s3 = inlined_call_operand.vmem [shape: f32[32,128], index: 3, kind: input, shape index: {}]   ;;  %s4221_s4 = inlined_call_operand.vmem [shape: f32[32,128], index: 4, kind: input, shape index: {}]   ;;  %s4222_s5 = inlined_call_operand.vmem [shape: f32[1,128], index: 5, kind: input, shape index: {}]   ;;  %s4223_s6 = inlined_call_operand.vmem [shape: f32[32,128], index: 6, kind: input, shape index: {}]   ;;  %s4224_s7 = inlined_call_operand.vmem [shape: f32[32,128], index: 7, kind: input, shape index: {}]   ;;  %s4225_s8 = inlined_call_operand.vmem [shape: f32[1,128], index: 8, kind: input, shape index: {}]   ;;  %s4226_s9 = inlined_call_operand.vmem [shape: f32[127,512], index: 9, kind: input, shape index: {}]   ;;  %s4227_s10 = inlined_call_operand.vmem [shape: f32[1,512], index: 10, kind: input, shape index: {}]   ;;  %s4228_s11 = inlined_call_operand.vmem [shape: f32[512,64], index: 11, kind: input, shape index: {}]   ;;  %s4229_s12 = inlined_call_operand.vmem [shape: f32[1,64], index: 12, kind: input, shape index: {}]   ;;  %s4230_s13 = inlined_call_operand.vmem [shape: f32[64,2], index: 13, kind: input, shape index: {}]   ;;  %s4231_s14 = inlined_call_operand.vmem [shape: f32[1,2], index: 14, kind: input, shape index: {}]   ;;  %s4232_s15 = inlined_call_operand.hbm [shape: f32[2,2], index: 15, kind: output, shape index: {}]  }
   0x1   :  { %v53_v0 = vld [vmem:[%s4218_s1] sm:$0x3]  ;;  %v52_v2 = vld [vmem:[%s4217_s0 + $0x8] sm:$0xff]  ;;  %v150_v3 = vld [vmem:[%s4220_s3 + $0x18] sm:$0xff] }
   0x2   :  { %v51_v1 = vld [vmem:[%s4217_s0] sm:$0xff]  ;;  %2911 = vmatprep.subr.msk.mxu0 %vm68_vm0, %v53_v0 }
   0x3   :  { %2913 = vmatprep.mubr.msk.f32.mxu0 %vm61_vm1, %v51_v1 }
   0x4   :  { %20 = vsyncpa [#allocation5], 0  ;;  %2912 = vmatpush3.msk.msra.mxu0 %vm68_vm0, %v53_v0  ;;  %v149_v4 = vld [vmem:[%s4220_s3 + $0x10] sm:$0xff]  ;;  %v148_v5 = vld [vmem:[%s4220_s3 + $0x8] sm:$0xff]  ;;  %v3290_v7 = vmov 0.0   ;;  %vm3291_vm2 = vmmov 0  }
   0x5   :  { %2914 = vmatmul.mubr.msk.f32.vlgmr.msra.gmra.mxu0 %vm61_vm1, %v52_v2  ;;  %2916 = vmatprep.subr.mxu0 %v150_v3  ;;  %v147_v6 = vld [vmem:[%s4220_s3] sm:$0xff]  ;;  %v3402_v8 = vld [vmem:[%s4221_s4 + $0x18] sm:$0xff]  ;;  %v3410_v9 = vld [vmem:[%s4221_s4 + $0x10] sm:$0xff]  ;;  %vm162_vm3 = vcmask 261120   ;;  %s3292_s24 = smov 64   ;;  %vm346_vm4 = vcmask 254976  }
   0x6   :  { %2917 = vmatpush3.msra.mxu0 %v150_v3  ;;  %2938 = vmatprep.subr.mxu1 %v3290_v7  ;;  %v3416_v10 = vld [vmem:[%s4221_s4 + $0x8] sm:$0xff]  ;;  %v3423_v11 = vld [vmem:[%s4221_s4] sm:$0xff]  ;;  %vm455_vm5 = vcmask 257026   ;;  %vm679_vm6 = vcmask 261126   ;;  %vm567_vm7 = vcmask 259076   ;;  %vm2212_vm8 = vcmask 1046528  }
   0x7   :  { %2918 = vmatprep.subr.mxu0 %v149_v4  ;;  %2939 = vmatpush3.msra.mxu1 %v3402_v8  ;;  %v2688_v13 = vld [vmem:[%s4219_s2] ss:$0 sm:$0xff]  ;;  %vm2096_vm9 = vcmask 517376   ;;  %s3294_s2 = smov 96   ;;  %vm2105_vm10 = vcmask 779776   ;;  %vm2114_vm11 = vcmask 1042176  }
   0x8   :  { %2919 = vmatpush3.msra.mxu0 %v149_v4  ;;  %2940 = vmatprep.subr.mxu1 %v3290_v7  ;;  %v2692_v17 = vld [vmem:[%s4222_s5] ss:$0 sm:$0xff]  ;;  %s3293_s5 = smov 32   ;;  %s3295_s30 = smov 127   ;;  %vm2208_vm12 = vcmask 1039360   ;;  %vm2598_vm13 = vcmask 523264  }
   0x9   :  { %2920 = vmatprep.subr.mxu0 %v148_v5  ;;  %2941 = vmatpush3.msra.mxu1 %v3410_v9  ;;  %vm2672_vm14 = vcmask 9216  }
   0xa   :  { %2921 = vmatpush3.msra.mxu0 %v148_v5  ;;  %2942 = vmatprep.subr.mxu1 %v3290_v7 }
   0xb   :  { %2922 = vmatprep.subr.mxu0 %v147_v6  ;;  %2943 = vmatpush3.msra.mxu1 %v3416_v10 }
   0xc   :  { %2923 = vmatpush3.msra.mxu0 %v147_v6  ;;  %2944 = vmatprep.subr.mxu1 %v3290_v7 }
   0xd   :  { %2927 = vmatprep.subr.mxu0 %v3290_v7  ;;  %2945 = vmatpush3.msra.mxu1 %v3423_v11 }
   0xe   :  { %2946 = vmatprep.mubr.msk.f32.mxu1 %vm3291_vm2, %v3290_v7  ;;  %2960 = vmatprep.subr.mxu1 %v3290_v7 }
  0xc5   :  { %v2915_v12 = vpop.f32.mrf.mxu0 }
  0xc6   :  { %v144_v16 = vadd.f32 %v2915_v12, %v2688_v13 }
  0xc7   :  { %v138_v14 = vpop.f32.mrf.mxu0 }
  0xc8   :  { %v139_v15 = vadd.f32 %v2688_v13, %v138_v14 }
  0xca   :  { %2924 = vmatprep.mubr.msk.f32.mxu0 %vm162_vm3, %v139_v15 }
  0xcb   :  { %2925 = vmatmul.mubr.msk.f32.vlgmr.msra.gmra.mxu0 %vm162_vm3, %v144_v16 }
  0xcc   :  { %2928 = vmatpush3.msra.mxu0 %v3402_v8  ;;  %2935 = vmatprep.mubr.msk.f32.mxu0 %vm3291_vm2, %v3290_v7 }
  0xcd   :  { %2929 = vmatprep.subr.mxu0 %v3290_v7 }
  0xce   :  { %2930 = vmatpush3.msra.mxu0 %v3410_v9 }
  0xcf   :  { %2931 = vmatprep.subr.mxu0 %v3290_v7 }
  0xd0   :  { %2932 = vmatpush3.msra.mxu0 %v3416_v10 }
  0xd1   :  { %2933 = vmatprep.subr.mxu0 %v3290_v7 }
  0xd2   :  { %2934 = vmatpush3.msra.mxu0 %v3423_v11 }
  0xd3   :  { %2936 = vmatmul.mubr.f32.vlgmr.msra.gmra.mxu0 %v3290_v7  ;;  %2949 = vmatprep.subr.mxu0 %v3290_v7 }
  0xd4   :  { %2950 = vmatpush3.msra.mxu0 %v3402_v8  ;;  %2957 = vmatprep.mubr.msk.f32.mxu0 %vm3291_vm2, %v3290_v7 }
  0xd5   :  { %2951 = vmatprep.subr.mxu0 %v3290_v7 }
  0xd6   :  { %2952 = vmatpush3.msra.mxu0 %v3410_v9 }
  0xd7   :  { %2953 = vmatprep.subr.mxu0 %v3290_v7 }
  0xd8   :  { %2954 = vmatpush3.msra.mxu0 %v3416_v10 }
  0xd9   :  { %2955 = vmatprep.subr.mxu0 %v3290_v7 }
  0xda   :  { %2956 = vmatpush3.msra.mxu0 %v3423_v11 }
  0xdb   :  { %2971 = vmatprep.subr.mxu0 %v3290_v7 }
 0x18b   :  { %v2926_v18 = vpop.f32.mrf.mxu0 }
 0x18c   :  { %v3459_v19 = vadd.f32 %v2926_v18, %v2692_v17 }
 0x18d   :  { %v235_v20 = vpop.f32.mrf.mxu0 }
 0x18e   :  { %v3461_v21 = vadd.f32 %v2692_v17, %v235_v20 }
 0x193   :  { %v313_v22 = vpop.f32.mrf.mxu0 }
 0x194   :  { %v317_v23 = vadd.f32 %v313_v22, %v3461_v21 }
 0x195   :  { %v2937_v24 = vpop.f32.mrf.mxu0 }
 0x196   :  { %3140 = vtanh.f32 %v317_v23  ;;  %v2695_v26 = vmul.f32 -1.442695, %v317_v23 }
 0x198   :  { %3142 = vpow2.f32 %v2695_v26 }
 0x1a3   :  { %v3141_v25 = vpop.eup %3140 }
 0x1a4   :  { %327 = vrot.lane.b32.xlu0 %v3141_v25, %s3292_s24 }
 0x1a5   :  { %v3143_v27 = vpop.eup %3142 }
 0x1a6   :  { %v321_v28 = vadd.f32 1.0, %v3143_v27 }
 0x1a8   :  { %3144 = vrcp.f32 %v321_v28 }
 0x1b5   :  { %v3145_v29 = vpop.eup %3144 }
 0x1b6   :  { %v325_v32 = vmul.f32 0.0, %v3145_v29 }
 0x216   :  { %v328_v30 = vpop.permute.xlu0 %327 }
 0x217   :  { %v330_v31 = vmul.f32 %v3145_v29, %v328_v30 }
 0x219   :  { %332 = vrot.lane.b32.xlu0 %v330_v31, %s3293_s5 }
 0x28b   :  { %v333_v33 = vpop.permute.xlu0 %332 }
 0x28c   :  { %v335_v34 = vadd.f32 %v333_v33, %v325_v32 }
 0x28e   :  { %3146 = vtanh.f32 %v335_v34  ;;  %v432_v50 = vrot.slane %v335_v34, 6 }
 0x29b   :  { %v3147_v35 = vpop.eup %3146 }
 0x29c   :  { %338 = vrot.lane.b32.xlu1 %v3147_v35, %s3292_s24 }
 0x30e   :  { %v339_v36 = vpop.permute.xlu1 %338 }
 0x30f   :  { %v341_v37 = vmul.f32 %v3145_v29, %v339_v36 }
 0x311   :  { %343 = vrot.lane.b32.xlu1 %v341_v37, %s3293_s5 }
 0x383   :  { %v344_v38 = vpop.permute.xlu1 %343 }
 0x384   :  { %347 = vst.msk [vmem:[#allocation2] sm:$0x3] %vm346_vm4, %v344_v38  ;;  %2947 = vmatmul.mubr.msk.f32.vlgmr.msra.gmra.mxu1 %vm162_vm3, %v344_v38 }
 0x385   :  { %2961 = vmatpush3.msra.mxu1 %v3402_v8  ;;  %2968 = vmatprep.mubr.msk.f32.mxu1 %vm3291_vm2, %v3290_v7 }
 0x386   :  { %2962 = vmatprep.subr.mxu1 %v3290_v7 }
 0x387   :  { %2963 = vmatpush3.msra.mxu1 %v3410_v9 }
 0x388   :  { %2964 = vmatprep.subr.mxu1 %v3290_v7 }
 0x389   :  { %2965 = vmatpush3.msra.mxu1 %v3416_v10 }
 0x38a   :  { %2966 = vmatprep.subr.mxu1 %v3290_v7 }
 0x38b   :  { %2967 = vmatpush3.msra.mxu1 %v3423_v11 }
 0x38c   :  { %2982 = vmatprep.subr.mxu1 %v3290_v7 }
 0x444   :  { %v416_v39 = vpop.f32.mrf.mxu1 }
 0x445   :  { %v421_v40 = vrot.slane %v416_v39, 6 }
 0x446   :  { %v2948_v41 = vpop.f32.mrf.mxu1 }
 0x447   :  { %v423_v42 = vadd.f32 %v421_v40, %v3461_v21 }
 0x449   :  { %3148 = vtanh.f32 %v423_v42  ;;  %v2697_v44 = vmul.f32 -1.442695, %v423_v42 }
 0x44b   :  { %3150 = vpow2.f32 %v2697_v44 }
 0x456   :  { %v3149_v43 = vpop.eup %3148 }
 0x457   :  { %436 = vrot.lane.b32.xlu0 %v3149_v43, %s3292_s24 }
 0x458   :  { %v3151_v45 = vpop.eup %3150 }
 0x459   :  { %v427_v46 = vadd.f32 1.0, %v3151_v45 }
 0x45b   :  { %3152 = vrcp.f32 %v427_v46 }
 0x468   :  { %v3153_v47 = vpop.eup %3152 }
 0x469   :  { %v434_v51 = vmul.f32 %v3153_v47, %v432_v50 }
 0x4c9   :  { %v437_v48 = vpop.permute.xlu0 %436 }
 0x4ca   :  { %v439_v49 = vmul.f32 %v3153_v47, %v437_v48 }
 0x4cc   :  { %441 = vrot.lane.b32.xlu1 %v439_v49, %s3293_s5 }
 0x53e   :  { %v442_v52 = vpop.permute.xlu1 %441 }
 0x53f   :  { %v444_v53 = vadd.f32 %v442_v52, %v434_v51 }
 0x541   :  { %3154 = vtanh.f32 %v444_v53  ;;  %v544_v6 = vrot.slane %v444_v53, 6 }
 0x54e   :  { %v3155_v54 = vpop.eup %3154 }
 0x54f   :  { %447 = vrot.lane.b32.xlu0 %v3155_v54, %s3292_s24 }
 0x5c1   :  { %v448_v55 = vpop.permute.xlu0 %447 }
 0x5c2   :  { %v3484_v56 = vmul.f32 %v3153_v47, %v448_v55 }
 0x5c4   :  { %v457_v57 = vrot.slane %v3484_v56, 2 }
 0x5c6   :  { %458 = vrot.lane.b32.xlu1 %v457_v57, %s3293_s5 }
 0x638   :  { %v459_v58 = vpop.permute.xlu1 %458 }
 0x639   :  { %2958 = vmatmul.mubr.msk.f32.vlgmr.msra.gmra.mxu0 %vm162_vm3, %v459_v58 }
 0x63a   :  { %2972 = vmatpush3.msra.mxu0 %v3402_v8  ;;  %2979 = vmatprep.mubr.msk.f32.mxu0 %vm3291_vm2, %v3290_v7 }
 0x63b   :  { %2973 = vmatprep.subr.mxu0 %v3290_v7 }
 0x63c   :  { %2974 = vmatpush3.msra.mxu0 %v3410_v9 }
 0x63d   :  { %2975 = vmatprep.subr.mxu0 %v3290_v7 }
 0x63e   :  { %2976 = vmatpush3.msra.mxu0 %v3416_v10 }
 0x63f   :  { %2977 = vmatprep.subr.mxu0 %v3290_v7 }
 0x640   :  { %2978 = vmatpush3.msra.mxu0 %v3423_v11 }
 0x641   :  { %2993 = vmatprep.subr.mxu0 %v3290_v7 }
 0x6f9   :  { %v528_v59 = vpop.f32.mrf.mxu0 }
 0x6fa   :  { %v533_v60 = vrot.slane %v528_v59, 4 }
 0x6fb   :  { %v2959_v61 = vpop.f32.mrf.mxu0 }
 0x6fc   :  { %v535_v62 = vadd.f32 %v533_v60, %v3461_v21 }
 0x6fe   :  { %3156 = vtanh.f32 %v535_v62  ;;  %v2699_v0 = vmul.f32 -1.442695, %v535_v62 }
 0x700   :  { %3158 = vpow2.f32 %v2699_v0 }
 0x70b   :  { %v3157_v63 = vpop.eup %3156 }
 0x70c   :  { %548 = vrot.lane.b32.xlu0 %v3157_v63, %s3292_s24 }
 0x70d   :  { %v3159_v1 = vpop.eup %3158 }
 0x70e   :  { %v539_v2 = vadd.f32 1.0, %v3159_v1 }
 0x710   :  { %3160 = vrcp.f32 %v539_v2 }
 0x71d   :  { %v3161_v3 = vpop.eup %3160 }
 0x71e   :  { %v546_v12 = vmul.f32 %v3161_v3, %v544_v6 }
 0x77e   :  { %v549_v4 = vpop.permute.xlu0 %548 }
 0x77f   :  { %v551_v5 = vmul.f32 %v3161_v3, %v549_v4 }
 0x781   :  { %553 = vrot.lane.b32.xlu1 %v551_v5, %s3293_s5 }
 0x7f3   :  { %v554_v13 = vpop.permute.xlu1 %553 }
 0x7f4   :  { %v556_v14 = vadd.f32 %v554_v13, %v546_v12 }
 0x7f6   :  { %3162 = vtanh.f32 %v556_v14  ;;  %v656_v33 = vrot.slane %v556_v14, 6 }
 0x803   :  { %v3163_v15 = vpop.eup %3162 }
 0x804   :  { %559 = vrot.lane.b32.xlu0 %v3163_v15, %s3292_s24 }
 0x876   :  { %v560_v16 = vpop.permute.xlu0 %559 }
 0x877   :  { %v3503_v17 = vmul.f32 %v3161_v3, %v560_v16 }
 0x879   :  { %v569_v18 = vrot.slane %v3503_v17, 4 }
 0x87b   :  { %570 = vrot.lane.b32.xlu1 %v569_v18, %s3293_s5 }
 0x8ed   :  { %v571_v20 = vpop.permute.xlu1 %570 }
 0x8ee   :  { %2969 = vmatmul.mubr.msk.f32.vlgmr.msra.gmra.mxu1 %vm162_vm3, %v571_v20 }
 0x8ef   :  { %2983 = vmatpush3.msra.mxu1 %v3402_v8  ;;  %2990 = vmatprep.mubr.msk.f32.mxu1 %vm3291_vm2, %v3290_v7 }
 0x8f0   :  { %2984 = vmatprep.subr.mxu1 %v3290_v7 }
 0x8f1   :  { %2985 = vmatpush3.msra.mxu1 %v3410_v9 }
 0x8f2   :  { %2986 = vmatprep.subr.mxu1 %v3290_v7 }
 0x8f3   :  { %2987 = vmatpush3.msra.mxu1 %v3416_v10 }
 0x8f4   :  { %2988 = vmatprep.subr.mxu1 %v3290_v7 }
 0x8f5   :  { %2989 = vmatpush3.msra.mxu1 %v3423_v11 }
 0x8f6   :  { %3004 = vmatprep.subr.mxu1 %v3290_v7 }
 0x9ae   :  { %v640_v22 = vpop.f32.mrf.mxu1 }
 0x9af   :  { %v645_v23 = vrot.slane %v640_v22, 2 }
 0x9b0   :  { %v2970_v24 = vpop.f32.mrf.mxu1 }
 0x9b1   :  { %v647_v25 = vadd.f32 %v645_v23, %v3461_v21 }
 0x9b3   :  { %3164 = vtanh.f32 %v647_v25  ;;  %v2701_v27 = vmul.f32 -1.442695, %v647_v25 }
 0x9b5   :  { %3166 = vpow2.f32 %v2701_v27 }
 0x9c0   :  { %v3165_v26 = vpop.eup %3164 }
 0x9c1   :  { %660 = vrot.lane.b32.xlu0 %v3165_v26, %s3292_s24 }
 0x9c2   :  { %v3167_v28 = vpop.eup %3166 }
 0x9c3   :  { %v651_v29 = vadd.f32 1.0, %v3167_v28 }
 0x9c5   :  { %3168 = vrcp.f32 %v651_v29 }
 0x9d2   :  { %v3169_v30 = vpop.eup %3168 }
 0x9d3   :  { %v658_v34 = vmul.f32 %v3169_v30, %v656_v33 }
 0xa33   :  { %v661_v31 = vpop.permute.xlu0 %660 }
 0xa34   :  { %v663_v32 = vmul.f32 %v3169_v30, %v661_v31 }
 0xa36   :  { %665 = vrot.lane.b32.xlu1 %v663_v32, %s3293_s5 }
 0xaa8   :  { %v666_v35 = vpop.permute.xlu1 %665 }
 0xaa9   :  { %v668_v36 = vadd.f32 %v666_v35, %v658_v34 }
 0xaab   :  { %3170 = vtanh.f32 %v668_v36  ;;  %v765_v51 = vrot.slane %v668_v36, 6 }
 0xab8   :  { %v3171_v21 = vpop.eup %3170 }
 0xab9   :  { %671 = vrot.lane.b32.xlu0 %v3171_v21, %s3292_s24 }
 0xb2b   :  { %v672_v37 = vpop.permute.xlu0 %671 }
 0xb2c   :  { %v3522_v38 = vmul.f32 %v3169_v30, %v672_v37 }
 0xb2e   :  { %v681_v39 = vrot.slane %v3522_v38, 6 }
 0xb30   :  { %682 = vrot.lane.b32.xlu1 %v681_v39, %s3293_s5 }
 0xba2   :  { %v683_v40 = vpop.permute.xlu1 %682 }
 0xba3   :  { %2980 = vmatmul.mubr.msk.f32.vlgmr.msra.gmra.mxu0 %vm162_vm3, %v683_v40 }
 0xba4   :  { %2994 = vmatpush3.msra.mxu0 %v3402_v8  ;;  %3001 = vmatprep.mubr.msk.f32.mxu0 %vm3291_vm2, %v3290_v7 }
 0xba5   :  { %2995 = vmatprep.subr.mxu0 %v3290_v7 }
 0xba6   :  { %2996 = vmatpush3.msra.mxu0 %v3410_v9 }
 0xba7   :  { %2997 = vmatprep.subr.mxu0 %v3290_v7 }
 0xba8   :  { %2998 = vmatpush3.msra.mxu0 %v3416_v10 }
 0xba9   :  { %2999 = vmatprep.subr.mxu0 %v3290_v7 }
 0xbaa   :  { %3000 = vmatpush3.msra.mxu0 %v3423_v11 }
 0xc63   :  { %v752_v41 = vpop.f32.mrf.mxu0 }
 0xc64   :  { %v756_v42 = vadd.f32 %v752_v41, %v3459_v19 }
 0xc65   :  { %v2981_v43 = vpop.f32.mrf.mxu0 }
 0xc66   :  { %3172 = vtanh.f32 %v756_v42  ;;  %v2703_v45 = vmul.f32 -1.442695, %v756_v42 }
 0xc68   :  { %3174 = vpow2.f32 %v2703_v45 }
 0xc73   :  { %v3173_v44 = vpop.eup %3172 }
 0xc74   :  { %769 = vrot.lane.b32.xlu0 %v3173_v44, %s3292_s24 }
 0xc75   :  { %v3175_v46 = vpop.eup %3174 }
 0xc76   :  { %v760_v47 = vadd.f32 1.0, %v3175_v46 }
 0xc78   :  { %3176 = vrcp.f32 %v760_v47 }
 0xc85   :  { %v3177_v48 = vpop.eup %3176 }
 0xc86   :  { %v767_v52 = vmul.f32 %v3177_v48, %v765_v51 }
 0xce6   :  { %v770_v49 = vpop.permute.xlu0 %769 }
 0xce7   :  { %v772_v50 = vmul.f32 %v3177_v48, %v770_v49 }
 0xce9   :  { %774 = vrot.lane.b32.xlu1 %v772_v50, %s3293_s5 }
 0xd5b   :  { %v775_v53 = vpop.permute.xlu1 %774 }
 0xd5c   :  { %v777_v54 = vadd.f32 %v775_v53, %v767_v52 }
 0xd5e   :  { %3178 = vtanh.f32 %v777_v54 }
 0xd6b   :  { %v3179_v55 = vpop.eup %3178 }
 0xd6c   :  { %780 = vrot.lane.b32.xlu0 %v3179_v55, %s3292_s24 }
 0xdde   :  { %v781_v57 = vpop.permute.xlu0 %780 }
 0xddf   :  { %v783_v58 = vmul.f32 %v3177_v48, %v781_v57  ;;  %v1124_v57 = vld [vmem:[%s4223_s6 + $0x18] sm:$0xff] }
 0xde0   :  { %3015 = vmatprep.subr.mxu0 %v1124_v57 }
 0xde1   :  { %785 = vrot.lane.b32.xlu1 %v783_v58, %s3293_s5  ;;  %v1123_v58 = vld [vmem:[%s4223_s6 + $0x10] sm:$0xff] }
 0xe53   :  { %v786_v59 = vpop.permute.xlu1 %785 }
 0xe54   :  { %788 = vst.msk [vmem:[#allocation2 + $0x8] sm:$0x3] %vm346_vm4, %v786_v59  ;;  %2991 = vmatmul.mubr.msk.f32.vlgmr.msra.gmra.mxu1 %vm162_vm3, %v786_v59  ;;  %v3595_v59 = vld [vmem:[%s4224_s7 + $0x18] sm:$0xff] }
 0xe55   :  { %3005 = vmatpush3.msra.mxu1 %v3402_v8  ;;  %3012 = vmatprep.mubr.msk.f32.mxu1 %vm3291_vm2, %v3290_v7 }
 0xe56   :  { %3006 = vmatprep.subr.mxu1 %v3290_v7 }
 0xe57   :  { %3007 = vmatpush3.msra.mxu1 %v3410_v9 }
 0xe58   :  { %3008 = vmatprep.subr.mxu1 %v3290_v7 }
 0xe59   :  { %3009 = vmatpush3.msra.mxu1 %v3416_v10 }
 0xe5a   :  { %3010 = vmatprep.subr.mxu1 %v3290_v7 }
 0xe5b   :  { %3011 = vmatpush3.msra.mxu1 %v3423_v11  ;;  %v873_v11 = vrot.slane %v777_v54, 6 }
 0xe5c   :  { %3026 = vmatprep.subr.mxu1 %v3290_v7 }
 0xf14   :  { %v857_v60 = vpop.f32.mrf.mxu1 }
 0xf15   :  { %v862_v61 = vrot.slane %v857_v60, 6  ;;  %v3604_v60 = vld [vmem:[%s4224_s7 + $0x10] sm:$0xff] }
 0xf16   :  { %v2992_v8 = vpop.f32.mrf.mxu1 }
 0xf17   :  { %v864_v62 = vadd.f32 %v862_v61, %v3459_v19  ;;  %v3610_v61 = vld [vmem:[%s4224_s7 + $0x8] sm:$0xff]  ;;  %v1121_v8 = vld [vmem:[%s4223_s6] sm:$0xff] }
 0xf19   :  { %3180 = vtanh.f32 %v864_v62  ;;  %v2705_v9 = vmul.f32 -1.442695, %v864_v62  ;;  %v3622_v62 = vld [vmem:[%s4224_s7] sm:$0xff] }
 0xf1b   :  { %3182 = vpow2.f32 %v2705_v9 }
 0xf26   :  { %v3181_v63 = vpop.eup %3180 }
 0xf27   :  { %877 = vrot.lane.b32.xlu0 %v3181_v63, %s3292_s24 }
 0xf28   :  { %v3183_v0 = vpop.eup %3182 }
 0xf29   :  { %v868_v1 = vadd.f32 1.0, %v3183_v0 }
 0xf2b   :  { %3184 = vrcp.f32 %v868_v1 }
 0xf38   :  { %v3185_v10 = vpop.eup %3184 }
 0xf39   :  { %v875_v4 = vmul.f32 %v3185_v10, %v873_v11 }
 0xf99   :  { %v878_v2 = vpop.permute.xlu0 %877 }
 0xf9a   :  { %v880_v3 = vmul.f32 %v3185_v10, %v878_v2 }
 0xf9c   :  { %882 = vrot.lane.b32.xlu1 %v880_v3, %s3293_s5 }
0x100e   :  { %v883_v5 = vpop.permute.xlu1 %882 }
0x100f   :  { %v885_v6 = vadd.f32 %v883_v5, %v875_v4  ;;  %v2710_v5 = vld [vmem:[%s4225_s8] ss:$0 sm:$0xff] }
0x1011   :  { %3186 = vtanh.f32 %v885_v6  ;;  %v984_v31 = vrot.slane %v885_v6, 6 }
0x101e   :  { %v3187_v12 = vpop.eup %3186 }
0x101f   :  { %888 = vrot.lane.b32.xlu0 %v3187_v12, %s3292_s24 }
0x1091   :  { %v889_v13 = vpop.permute.xlu0 %888 }
0x1092   :  { %v3557_v14 = vmul.f32 %v3185_v10, %v889_v13 }
0x1094   :  { %v897_v15 = vrot.slane %v3557_v14, 2 }
0x1096   :  { %898 = vrot.lane.b32.xlu1 %v897_v15, %s3293_s5 }
0x1108   :  { %v899_v16 = vpop.permute.xlu1 %898 }
0x1109   :  { %3002 = vmatmul.mubr.msk.f32.vlgmr.msra.gmra.mxu0 %vm162_vm3, %v899_v16 }
0x110a   :  { %3016 = vmatpush3.msra.mxu0 %v1124_v57 }
0x110b   :  { %3017 = vmatprep.subr.mxu0 %v1123_v58 }
0x110c   :  { %3018 = vmatpush3.msra.mxu0 %v1123_v58 }
0x11c9   :  { %v968_v18 = vpop.f32.mrf.mxu0 }
0x11ca   :  { %v973_v20 = vrot.slane %v968_v18, 4 }
0x11cb   :  { %v3003_v22 = vpop.f32.mrf.mxu0 }
0x11cc   :  { %v975_v23 = vadd.f32 %v973_v20, %v3459_v19 }
0x11ce   :  { %3188 = vtanh.f32 %v975_v23  ;;  %v2707_v25 = vmul.f32 -1.442695, %v975_v23 }
0x11d0   :  { %3190 = vpow2.f32 %v2707_v25 }
0x11db   :  { %v3189_v24 = vpop.eup %3188 }
0x11dc   :  { %988 = vrot.lane.b32.xlu0 %v3189_v24, %s3292_s24 }
0x11dd   :  { %v3191_v26 = vpop.eup %3190 }
0x11de   :  { %v979_v27 = vadd.f32 1.0, %v3191_v26 }
0x11e0   :  { %3192 = vrcp.f32 %v979_v27 }
0x11ed   :  { %v3193_v28 = vpop.eup %3192 }
0x11ee   :  { %v986_v32 = vmul.f32 %v3193_v28, %v984_v31 }
0x124e   :  { %v989_v29 = vpop.permute.xlu0 %988 }
0x124f   :  { %v991_v30 = vmul.f32 %v3193_v28, %v989_v29 }
0x1251   :  { %993 = vrot.lane.b32.xlu1 %v991_v30, %s3293_s5 }
0x12c3   :  { %v994_v33 = vpop.permute.xlu1 %993 }
0x12c4   :  { %v996_v34 = vadd.f32 %v994_v33, %v986_v32 }
0x12c6   :  { %3194 = vtanh.f32 %v996_v34 }
0x12d3   :  { %v3195_v35 = vpop.eup %3194 }
0x12d4   :  { %999 = vrot.lane.b32.xlu0 %v3195_v35, %s3292_s24 }
0x1346   :  { %v1000_v36 = vpop.permute.xlu0 %999 }
0x1347   :  { %v1002_v21 = vmul.f32 %v3193_v28, %v1000_v36 }
0x1349   :  { %v1008_v37 = vrot.slane %v1002_v21, 4 }
0x134b   :  { %1009 = vrot.lane.b32.xlu1 %v1008_v37, %s3293_s5 }
0x13bd   :  { %v1010_v39 = vpop.permute.xlu1 %1009 }
0x13be   :  { %3013 = vmatmul.mubr.msk.f32.vlgmr.msra.gmra.mxu1 %vm162_vm3, %v1010_v39 }
0x13bf   :  { %3034 = vmatprep.mubr.msk.f32.mxu1 %vm3291_vm2, %v3290_v7  ;;  %3027 = vmatpush3.msra.mxu1 %v3595_v59 }
0x13c0   :  { %3028 = vmatprep.subr.mxu1 %v3290_v7 }
0x13c1   :  { %3029 = vmatpush3.msra.mxu1 %v3604_v60 }
0x13c2   :  { %3030 = vmatprep.subr.mxu1 %v3290_v7 }
0x13c3   :  { %3031 = vmatpush3.msra.mxu1 %v3610_v61 }
0x13c4   :  { %3032 = vmatprep.subr.mxu1 %v3290_v7 }
0x13c5   :  { %3033 = vmatpush3.msra.mxu1 %v3622_v62 }
0x13c6   :  { %3035 = vmatmul.mubr.f32.vlgmr.msra.gmra.mxu1 %v3290_v7  ;;  %3048 = vmatprep.subr.mxu1 %v3290_v7 }
0x13c7   :  { %3049 = vmatpush3.msra.mxu1 %v3595_v59  ;;  %3056 = vmatprep.mubr.msk.f32.mxu1 %vm3291_vm2, %v3290_v7 }
0x13c8   :  { %3050 = vmatprep.subr.mxu1 %v3290_v7 }
0x13c9   :  { %3051 = vmatpush3.msra.mxu1 %v3604_v60 }
0x13ca   :  { %3052 = vmatprep.subr.mxu1 %v3290_v7 }
0x13cb   :  { %3053 = vmatpush3.msra.mxu1 %v3610_v61 }
0x13cc   :  { %3054 = vmatprep.subr.mxu1 %v3290_v7 }
0x13cd   :  { %3055 = vmatpush3.msra.mxu1 %v3622_v62 }
0x13ce   :  { %3070 = vmatprep.subr.mxu1 %v3290_v7 }
0x147e   :  { %v1079_v40 = vpop.f32.mrf.mxu1 }
0x147f   :  { %v1084_v41 = vrot.slane %v1079_v40, 2 }
0x1480   :  { %v3014_v42 = vpop.f32.mrf.mxu1 }
0x1481   :  { %v1086_v43 = vadd.f32 %v1084_v41, %v3459_v19  ;;  %v1095_v19 = vrot.slane %v996_v34, 6 }
0x1483   :  { %3196 = vtanh.f32 %v1086_v43  ;;  %v2709_v45 = vmul.f32 -1.442695, %v1086_v43 }
0x1485   :  { %3198 = vpow2.f32 %v2709_v45 }
0x1486   :  { %v1283_v11 = vpop.f32.mrf.mxu1 }
0x1488   :  { %v3036_v4 = vpop.f32.mrf.mxu1 }
0x1490   :  { %v3197_v44 = vpop.eup %3196 }
0x1491   :  { %1099 = vrot.lane.b32.xlu0 %v3197_v44, %s3292_s24 }
0x1492   :  { %v3199_v46 = vpop.eup %3198 }
0x1493   :  { %v1090_v47 = vadd.f32 1.0, %v3199_v46 }
0x1495   :  { %3200 = vrcp.f32 %v1090_v47 }
0x14a2   :  { %v3201_v48 = vpop.eup %3200 }
0x14a3   :  { %v1097_v51 = vmul.f32 %v3201_v48, %v1095_v19 }
0x1503   :  { %v1100_v49 = vpop.permute.xlu0 %1099 }
0x1504   :  { %v1102_v50 = vmul.f32 %v3201_v48, %v1100_v49 }
0x1506   :  { %1104 = vrot.lane.b32.xlu1 %v1102_v50, %s3293_s5 }
0x150a   :  { %452 = vrot.lane.b32.xlu1 %v3484_v56, %s3293_s5 }
0x150e   :  { %676 = vrot.lane.b32.xlu1 %v3522_v38, %s3293_s5 }
0x1512   :  { %1004 = vrot.lane.b32.xlu1 %v1002_v21, %s3293_s5 }
0x1578   :  { %v1105_v52 = vpop.permute.xlu1 %1104 }
0x1579   :  { %v1107_v53 = vadd.f32 %v1105_v52, %v1097_v51 }
0x157b   :  { %3202 = vtanh.f32 %v1107_v53 }
0x157c   :  { %v453_v54 = vpop.permute.xlu1 %452 }
0x157d   :  { %456 = vst.msk [vmem:[#allocation2] sm:$0xc] %vm455_vm5, %v453_v54 }
0x1580   :  { %v677_v55 = vpop.permute.xlu1 %676 }
0x1581   :  { %680 = vst.msk [vmem:[#allocation2] sm:$0xc0] %vm679_vm6, %v677_v55 }
0x1584   :  { %v1005_v56 = vpop.permute.xlu1 %1004 }
0x1585   :  { %1007 = vst.msk [vmem:[#allocation2 + $0x8] sm:$0x30] %vm567_vm7, %v1005_v56 }
0x1588   :  { %v3203_v38 = vpop.eup %3202 }
0x1589   :  { %1110 = vrot.lane.b32.xlu0 %v3203_v38, %s3292_s24 }
0x158d   :  { %564 = vrot.lane.b32.xlu0 %v3503_v17, %s3293_s5  ;;  %v1122_v17 = vld [vmem:[%s4223_s6 + $0x8] sm:$0xff] }
0x158e   :  { %3019 = vmatprep.subr.mxu0 %v1122_v17 }
0x158f   :  { %3020 = vmatpush3.msra.mxu0 %v1122_v17 }
0x1590   :  { %3021 = vmatprep.subr.mxu0 %v1121_v8 }
0x1591   :  { %893 = vrot.lane.b32.xlu0 %v3557_v14, %s3293_s5  ;;  %3022 = vmatpush3.msra.mxu0 %v1121_v8 }
0x1592   :  { %3037 = vmatprep.subr.mxu0 %v3290_v7 }
0x15fb   :  { %v1111_v63 = vpop.permute.xlu0 %1110 }
0x15fc   :  { %v1113_v9 = vmul.f32 %v3201_v48, %v1111_v63 }
0x15fe   :  { %1115 = vrot.lane.b32.xlu0 %v1113_v9, %s3293_s5 }
0x15ff   :  { %v565_v0 = vpop.permute.xlu0 %564 }
0x1600   :  { %568 = vst.msk [vmem:[#allocation2] sm:$0x30] %vm567_vm7, %v565_v0 }
0x1603   :  { %v894_v1 = vpop.permute.xlu0 %893 }
0x1604   :  { %896 = vst.msk [vmem:[#allocation2 + $0x8] sm:$0xc] %vm455_vm5, %v894_v1 }
0x1607   :  { %v1119_v10 = vld [vmem:[#allocation2] sm:$0xff] }
0x1608   :  { %3023 = vmatprep.mubr.msk.f32.mxu0 %vm162_vm3, %v1119_v10 }
0x1670   :  { %v1116_v2 = vpop.permute.xlu0 %1115 }
0x1671   :  { %1118 = vst.msk [vmem:[#allocation2 + $0x8] sm:$0xc0] %vm679_vm6, %v1116_v2 }
0x1678   :  { %v1120_v3 = vld [vmem:[#allocation2 + $0x8] sm:$0xff] }
0x1679   :  { %3024 = vmatmul.mubr.msk.f32.vlgmr.msra.gmra.mxu0 %vm162_vm3, %v1120_v3 }
0x167a   :  { %3038 = vmatpush3.msra.mxu0 %v3595_v59  ;;  %3045 = vmatprep.mubr.msk.f32.mxu0 %vm3291_vm2, %v3290_v7 }
0x167b   :  { %3039 = vmatprep.subr.mxu0 %v3290_v7 }
0x167c   :  { %3040 = vmatpush3.msra.mxu0 %v3604_v60 }
0x167d   :  { %3041 = vmatprep.subr.mxu0 %v3290_v7 }
0x167e   :  { %3042 = vmatpush3.msra.mxu0 %v3610_v61 }
0x167f   :  { %3043 = vmatprep.subr.mxu0 %v3290_v7 }
0x1680   :  { %3044 = vmatpush3.msra.mxu0 %v3622_v62 }
0x1681   :  { %3059 = vmatprep.subr.mxu0 %v3290_v7 }
0x1739   :  { %v3025_v6 = vpop.f32.mrf.mxu0 }
0x173a   :  { %v3657_v12 = vadd.f32 %v3025_v6, %v2710_v5 }
0x173b   :  { %v1208_v13 = vpop.f32.mrf.mxu0 }
0x173c   :  { %v3659_v14 = vadd.f32 %v2710_v5, %v1208_v13 }
0x173e   :  { %v1287_v15 = vadd.f32 %v1283_v11, %v3659_v14 }
0x1740   :  { %3204 = vtanh.f32 %v1287_v15  ;;  %v2713_v18 = vmul.f32 -1.442695, %v1287_v15 }
0x1742   :  { %3206 = vpow2.f32 %v2713_v18 }
0x174d   :  { %v3205_v16 = vpop.eup %3204 }
0x174e   :  { %1297 = vrot.lane.b32.xlu1 %v3205_v16, %s3292_s24 }
0x174f   :  { %v3207_v20 = vpop.eup %3206 }
0x1750   :  { %v1291_v22 = vadd.f32 1.0, %v3207_v20 }
0x1752   :  { %3208 = vrcp.f32 %v1291_v22 }
0x175f   :  { %v3209_v23 = vpop.eup %3208 }
0x1760   :  { %v1295_v26 = vmul.f32 0.0, %v3209_v23 }
0x17c0   :  { %v1298_v24 = vpop.permute.xlu1 %1297 }
0x17c1   :  { %v1300_v25 = vmul.f32 %v3209_v23, %v1298_v24 }
0x17c3   :  { %1302 = vrot.lane.b32.xlu0 %v1300_v25, %s3293_s5 }
0x1835   :  { %v1303_v27 = vpop.permute.xlu0 %1302 }
0x1836   :  { %v1305_v28 = vadd.f32 %v1303_v27, %v1295_v26 }
0x1838   :  { %3210 = vtanh.f32 %v1305_v28  ;;  %v1401_v44 = vrot.slane %v1305_v28, 6 }
0x1845   :  { %v3211_v29 = vpop.eup %3210 }
0x1846   :  { %1308 = vrot.lane.b32.xlu1 %v3211_v29, %s3292_s24 }
0x18b8   :  { %v1309_v30 = vpop.permute.xlu1 %1308 }
0x18b9   :  { %v1311_v31 = vmul.f32 %v3209_v23, %v1309_v30 }
0x18bb   :  { %1313 = vrot.lane.b32.xlu0 %v1311_v31, %s3293_s5 }
0x192d   :  { %v1314_v32 = vpop.permute.xlu0 %1313 }
0x192e   :  { %1316 = vst.msk [vmem:[#allocation2] sm:$0x3] %vm346_vm4, %v1314_v32  ;;  %3046 = vmatmul.mubr.msk.f32.vlgmr.msra.gmra.mxu0 %vm162_vm3, %v1314_v32 }
0x192f   :  { %3060 = vmatpush3.msra.mxu0 %v3595_v59  ;;  %3067 = vmatprep.mubr.msk.f32.mxu0 %vm3291_vm2, %v3290_v7 }
0x1930   :  { %3061 = vmatprep.subr.mxu0 %v3290_v7 }
0x1931   :  { %3062 = vmatpush3.msra.mxu0 %v3604_v60 }
0x1932   :  { %3063 = vmatprep.subr.mxu0 %v3290_v7 }
0x1933   :  { %3064 = vmatpush3.msra.mxu0 %v3610_v61 }
0x1934   :  { %3065 = vmatprep.subr.mxu0 %v3290_v7 }
0x1935   :  { %3066 = vmatpush3.msra.mxu0 %v3622_v62 }
0x1936   :  { %3081 = vmatprep.subr.mxu0 %v3290_v7 }
0x19ee   :  { %v1385_v33 = vpop.f32.mrf.mxu0 }
0x19ef   :  { %v1390_v34 = vrot.slane %v1385_v33, 6 }
0x19f0   :  { %v3047_v35 = vpop.f32.mrf.mxu0 }
0x19f1   :  { %v1392_v36 = vadd.f32 %v1390_v34, %v3659_v14 }
0x19f3   :  { %3212 = vtanh.f32 %v1392_v36  ;;  %v2715_v37 = vmul.f32 -1.442695, %v1392_v36 }
0x19f5   :  { %3214 = vpow2.f32 %v2715_v37 }
0x1a00   :  { %v3213_v21 = vpop.eup %3212 }
0x1a01   :  { %1405 = vrot.lane.b32.xlu1 %v3213_v21, %s3292_s24 }
0x1a02   :  { %v3215_v39 = vpop.eup %3214 }
0x1a03   :  { %v1396_v40 = vadd.f32 1.0, %v3215_v39 }
0x1a05   :  { %3216 = vrcp.f32 %v1396_v40 }
0x1a12   :  { %v3217_v41 = vpop.eup %3216 }
0x1a13   :  { %v1403_v45 = vmul.f32 %v3217_v41, %v1401_v44 }
0x1a73   :  { %v1406_v42 = vpop.permute.xlu1 %1405 }
0x1a74   :  { %v1408_v43 = vmul.f32 %v3217_v41, %v1406_v42 }
0x1a76   :  { %1410 = vrot.lane.b32.xlu0 %v1408_v43, %s3293_s5 }
0x1ae8   :  { %v1411_v46 = vpop.permute.xlu0 %1410 }
0x1ae9   :  { %v1413_v47 = vadd.f32 %v1411_v46, %v1403_v45 }
0x1aeb   :  { %3218 = vtanh.f32 %v1413_v47  ;;  %v1512_v9 = vrot.slane %v1413_v47, 6 }
0x1af8   :  { %v3219_v48 = vpop.eup %3218 }
0x1af9   :  { %1416 = vrot.lane.b32.xlu1 %v3219_v48, %s3292_s24 }
0x1b6b   :  { %v1417_v49 = vpop.permute.xlu1 %1416 }
0x1b6c   :  { %v3682_v50 = vmul.f32 %v3217_v41, %v1417_v49 }
0x1b6e   :  { %v1425_v19 = vrot.slane %v3682_v50, 2 }
0x1b70   :  { %1426 = vrot.lane.b32.xlu0 %v1425_v19, %s3293_s5 }
0x1be2   :  { %v1427_v51 = vpop.permute.xlu0 %1426 }
0x1be3   :  { %3057 = vmatmul.mubr.msk.f32.vlgmr.msra.gmra.mxu1 %vm162_vm3, %v1427_v51 }
0x1be4   :  { %3071 = vmatpush3.msra.mxu1 %v3595_v59  ;;  %3078 = vmatprep.mubr.msk.f32.mxu1 %vm3291_vm2, %v3290_v7 }
0x1be5   :  { %3072 = vmatprep.subr.mxu1 %v3290_v7 }
0x1be6   :  { %3073 = vmatpush3.msra.mxu1 %v3604_v60 }
0x1be7   :  { %3074 = vmatprep.subr.mxu1 %v3290_v7 }
0x1be8   :  { %3075 = vmatpush3.msra.mxu1 %v3610_v61 }
0x1be9   :  { %3076 = vmatprep.subr.mxu1 %v3290_v7 }
0x1bea   :  { %3077 = vmatpush3.msra.mxu1 %v3622_v62 }
0x1beb   :  { %3092 = vmatprep.subr.mxu1 %v3290_v7 }
0x1ca3   :  { %v1496_v52 = vpop.f32.mrf.mxu1 }
0x1ca4   :  { %v1501_v53 = vrot.slane %v1496_v52, 4 }
0x1ca5   :  { %v3058_v54 = vpop.f32.mrf.mxu1 }
0x1ca6   :  { %v1503_v55 = vadd.f32 %v1501_v53, %v3659_v14 }
0x1ca8   :  { %3220 = vtanh.f32 %v1503_v55  ;;  %v2717_v38 = vmul.f32 -1.442695, %v1503_v55 }
0x1caa   :  { %3222 = vpow2.f32 %v2717_v38 }
0x1cb5   :  { %v3221_v56 = vpop.eup %3220 }
0x1cb6   :  { %1516 = vrot.lane.b32.xlu1 %v3221_v56, %s3292_s24 }
0x1cb7   :  { %v3223_v57 = vpop.eup %3222 }
0x1cb8   :  { %v1507_v58 = vadd.f32 1.0, %v3223_v57 }
0x1cba   :  { %3224 = vrcp.f32 %v1507_v58 }
0x1cc7   :  { %v3225_v17 = vpop.eup %3224 }
0x1cc8   :  { %v1514_v0 = vmul.f32 %v3225_v17, %v1512_v9 }
0x1d28   :  { %v1517_v8 = vpop.permute.xlu1 %1516 }
0x1d29   :  { %v1519_v63 = vmul.f32 %v3225_v17, %v1517_v8 }
0x1d2b   :  { %1521 = vrot.lane.b32.xlu0 %v1519_v63, %s3293_s5 }
0x1d9d   :  { %v1522_v1 = vpop.permute.xlu0 %1521 }
0x1d9e   :  { %v1524_v10 = vadd.f32 %v1522_v1, %v1514_v0 }
0x1da0   :  { %3226 = vtanh.f32 %v1524_v10  ;;  %v1623_v27 = vrot.slane %v1524_v10, 6 }
0x1dad   :  { %v3227_v2 = vpop.eup %3226 }
0x1dae   :  { %1527 = vrot.lane.b32.xlu1 %v3227_v2, %s3292_s24 }
0x1e20   :  { %v1528_v3 = vpop.permute.xlu1 %1527 }
0x1e21   :  { %v3701_v11 = vmul.f32 %v3225_v17, %v1528_v3 }
0x1e23   :  { %v1536_v4 = vrot.slane %v3701_v11, 4 }
0x1e25   :  { %1537 = vrot.lane.b32.xlu0 %v1536_v4, %s3293_s5 }
0x1e97   :  { %v1538_v5 = vpop.permute.xlu0 %1537 }
0x1e98   :  { %3068 = vmatmul.mubr.msk.f32.vlgmr.msra.gmra.mxu0 %vm162_vm3, %v1538_v5 }
0x1e99   :  { %3082 = vmatpush3.msra.mxu0 %v3595_v59  ;;  %3089 = vmatprep.mubr.msk.f32.mxu0 %vm3291_vm2, %v3290_v7 }
0x1e9a   :  { %3083 = vmatprep.subr.mxu0 %v3290_v7 }
0x1e9b   :  { %3084 = vmatpush3.msra.mxu0 %v3604_v60 }
0x1e9c   :  { %3085 = vmatprep.subr.mxu0 %v3290_v7 }
0x1e9d   :  { %3086 = vmatpush3.msra.mxu0 %v3610_v61 }
0x1e9e   :  { %3087 = vmatprep.subr.mxu0 %v3290_v7 }
0x1e9f   :  { %3088 = vmatpush3.msra.mxu0 %v3622_v62 }
0x1ea0   :  { %3103 = vmatprep.subr.mxu0 %v3290_v7 }
0x1f58   :  { %v1607_v6 = vpop.f32.mrf.mxu0 }
0x1f59   :  { %v1612_v13 = vrot.slane %v1607_v6, 2 }
0x1f5a   :  { %v3069_v15 = vpop.f32.mrf.mxu0 }
0x1f5b   :  { %v1614_v16 = vadd.f32 %v1612_v13, %v3659_v14 }
0x1f5d   :  { %3228 = vtanh.f32 %v1614_v16  ;;  %v2719_v20 = vmul.f32 -1.442695, %v1614_v16 }
0x1f5f   :  { %3230 = vpow2.f32 %v2719_v20 }
0x1f6a   :  { %v3229_v18 = vpop.eup %3228 }
0x1f6b   :  { %1627 = vrot.lane.b32.xlu1 %v3229_v18, %s3292_s24 }
0x1f6c   :  { %v3231_v22 = vpop.eup %3230 }
0x1f6d   :  { %v1618_v23 = vadd.f32 1.0, %v3231_v22 }
0x1f6f   :  { %3232 = vrcp.f32 %v1618_v23 }
0x1f7c   :  { %v3233_v24 = vpop.eup %3232 }
0x1f7d   :  { %v1625_v28 = vmul.f32 %v3233_v24, %v1623_v27 }
0x1fdd   :  { %v1628_v25 = vpop.permute.xlu1 %1627 }
0x1fde   :  { %v1630_v26 = vmul.f32 %v3233_v24, %v1628_v25 }
0x1fe0   :  { %1632 = vrot.lane.b32.xlu0 %v1630_v26, %s3293_s5 }
0x2052   :  { %v1633_v29 = vpop.permute.xlu0 %1632 }
0x2053   :  { %v1635_v30 = vadd.f32 %v1633_v29, %v1625_v28 }
0x2055   :  { %3234 = vtanh.f32 %v1635_v30  ;;  %v1731_v45 = vrot.slane %v1635_v30, 6 }
0x2062   :  { %v3235_v14 = vpop.eup %3234 }
0x2063   :  { %1638 = vrot.lane.b32.xlu1 %v3235_v14, %s3292_s24 }
0x20d5   :  { %v1639_v31 = vpop.permute.xlu1 %1638 }
0x20d6   :  { %v3720_v32 = vmul.f32 %v3233_v24, %v1639_v31 }
0x20d8   :  { %v1647_v33 = vrot.slane %v3720_v32, 6 }
0x20da   :  { %1648 = vrot.lane.b32.xlu0 %v1647_v33, %s3293_s5 }
0x214c   :  { %v1649_v34 = vpop.permute.xlu0 %1648 }
0x214d   :  { %3079 = vmatmul.mubr.msk.f32.vlgmr.msra.gmra.mxu1 %vm162_vm3, %v1649_v34 }
0x214e   :  { %3093 = vmatpush3.msra.mxu1 %v3595_v59  ;;  %3100 = vmatprep.mubr.msk.f32.mxu1 %vm3291_vm2, %v3290_v7 }
0x214f   :  { %3094 = vmatprep.subr.mxu1 %v3290_v7 }
0x2150   :  { %3095 = vmatpush3.msra.mxu1 %v3604_v60 }
0x2151   :  { %3096 = vmatprep.subr.mxu1 %v3290_v7 }
0x2152   :  { %3097 = vmatpush3.msra.mxu1 %v3610_v61 }
0x2153   :  { %3098 = vmatprep.subr.mxu1 %v3290_v7 }
0x2154   :  { %3099 = vmatpush3.msra.mxu1 %v3622_v62 }
0x220d   :  { %v1718_v35 = vpop.f32.mrf.mxu1 }
0x220e   :  { %v1722_v36 = vadd.f32 %v1718_v35, %v3657_v12 }
0x220f   :  { %v3080_v21 = vpop.f32.mrf.mxu1 }
0x2210   :  { %3236 = vtanh.f32 %v1722_v36  ;;  %v2721_v39 = vmul.f32 -1.442695, %v1722_v36 }
0x2212   :  { %3238 = vpow2.f32 %v2721_v39 }
0x221d   :  { %v3237_v37 = vpop.eup %3236 }
0x221e   :  { %1735 = vrot.lane.b32.xlu1 %v3237_v37, %s3292_s24 }
0x221f   :  { %v3239_v40 = vpop.eup %3238 }
0x2220   :  { %v1726_v41 = vadd.f32 1.0, %v3239_v40 }
0x2222   :  { %3240 = vrcp.f32 %v1726_v41 }
0x222f   :  { %v3241_v42 = vpop.eup %3240 }
0x2230   :  { %v1733_v46 = vmul.f32 %v3241_v42, %v1731_v45 }
0x2290   :  { %v1736_v43 = vpop.permute.xlu1 %1735 }
0x2291   :  { %v1738_v44 = vmul.f32 %v3241_v42, %v1736_v43 }
0x2293   :  { %1740 = vrot.lane.b32.xlu0 %v1738_v44, %s3293_s5 }
0x2305   :  { %v1741_v47 = vpop.permute.xlu0 %1740 }
0x2306   :  { %v1743_v48 = vadd.f32 %v1741_v47, %v1733_v46 }
0x2308   :  { %3242 = vtanh.f32 %v1743_v48 }
0x2315   :  { %v3243_v49 = vpop.eup %3242 }
0x2316   :  { %1746 = vrot.lane.b32.xlu1 %v3243_v49, %s3292_s24 }
0x2388   :  { %v1747_v19 = vpop.permute.xlu1 %1746 }
0x2389   :  { %v1749_v51 = vmul.f32 %v3241_v42, %v1747_v19 }
0x238b   :  { %1751 = vrot.lane.b32.xlu0 %v1749_v51, %s3293_s5 }
0x23fd   :  { %v1752_v52 = vpop.permute.xlu0 %1751 }
0x23fe   :  { %1754 = vst.msk [vmem:[#allocation2 + $0x8] sm:$0x3] %vm346_vm4, %v1752_v52  ;;  %3090 = vmatmul.mubr.msk.f32.vlgmr.msra.gmra.mxu0 %vm162_vm3, %v1752_v52 }
0x23ff   :  { %3104 = vmatpush3.msra.mxu0 %v3595_v59  ;;  %3111 = vmatprep.mubr.msk.f32.mxu0 %vm3291_vm2, %v3290_v7 }
0x2400   :  { %3105 = vmatprep.subr.mxu0 %v3290_v7 }
0x2401   :  { %3106 = vmatpush3.msra.mxu0 %v3604_v60 }
0x2402   :  { %3107 = vmatprep.subr.mxu0 %v3290_v7 }
0x2403   :  { %3108 = vmatpush3.msra.mxu0 %v3610_v61 }
0x2404   :  { %3109 = vmatprep.subr.mxu0 %v3290_v7 }
0x2405   :  { %3110 = vmatpush3.msra.mxu0 %v3622_v62  ;;  %v1839_v62 = vrot.slane %v1743_v48, 6  ;;  %v2098_v51 = vld [vmem:[#allocation2 + $0x8] sm:$0x3] }
0x24be   :  { %v1823_v53 = vpop.f32.mrf.mxu0 }
0x24bf   :  { %v1828_v54 = vrot.slane %v1823_v53, 6 }
0x24c0   :  { %v3091_v55 = vpop.f32.mrf.mxu0 }
0x24c1   :  { %v1830_v59 = vadd.f32 %v1828_v54, %v3657_v12 }
0x24c3   :  { %3244 = vtanh.f32 %v1830_v59  ;;  %v2723_v38 = vmul.f32 -1.442695, %v1830_v59 }
0x24c5   :  { %3246 = vpow2.f32 %v2723_v38 }
0x24d0   :  { %v3245_v56 = vpop.eup %3244 }
0x24d1   :  { %1843 = vrot.lane.b32.xlu1 %v3245_v56, %s3292_s24 }
0x24d2   :  { %v3247_v60 = vpop.eup %3246 }
0x24d3   :  { %v1834_v57 = vadd.f32 1.0, %v3247_v60  ;;  %v2085_v60 = vld [vmem:[#allocation2] sm:$0x3] }
0x24d5   :  { %3248 = vrcp.f32 %v1834_v57 }
0x24e2   :  { %v3249_v58 = vpop.eup %3248 }
0x24e3   :  { %v1841_v8 = vmul.f32 %v3249_v58, %v1839_v62  ;;  %v2183_v62 = vld [vmem:[%s4226_s9 + $0x1e8] sm:$0x7f] }
0x24e4   :  { %2728 = vmatprep.subr.msk.mxu1 %vm2212_vm8, %v2183_v62  ;;  %v2128_v62 = vld [vmem:[%s4226_s9 + $0x30] sm:$0xff] }
0x2543   :  { %v1844_v61 = vpop.permute.xlu1 %1843 }
0x2544   :  { %v1846_v17 = vmul.f32 %v3249_v58, %v1844_v61 }
0x2546   :  { %1848 = vrot.lane.b32.xlu0 %v1846_v17, %s3293_s5 }
0x25b8   :  { %v1849_v63 = vpop.permute.xlu0 %1848 }
0x25b9   :  { %v1851_v9 = vadd.f32 %v1849_v63, %v1841_v8  ;;  %v2185_v8 = vld [vmem:[%s4226_s9 + $0x1f8] sm:$0x7f]  ;;  %v2179_v63 = vld [vmem:[%s4226_s9 + $0x1c8] sm:$0xff] }
0x25ba   :  { %2731 = vmatprep.subr.msk.mxu0 %vm2212_vm8, %v2185_v8  ;;  %v2123_v8 = vld [vmem:[%s4226_s9 + $0x8] sm:$0xff] }
0x25bb   :  { %3250 = vtanh.f32 %v1851_v9  ;;  %v1950_v25 = vrot.slane %v1851_v9, 6  ;;  %v2182_v9 = vld [vmem:[%s4226_s9 + $0x1e0] sm:$0x7f] }
0x25c8   :  { %v3251_v0 = vpop.eup %3250 }
0x25c9   :  { %1854 = vrot.lane.b32.xlu1 %v3251_v0, %s3292_s24  ;;  %v2184_v0 = vld [vmem:[%s4226_s9 + $0x1f0] sm:$0x7f] }
0x263b   :  { %v1855_v1 = vpop.permute.xlu1 %1854 }
0x263c   :  { %v1857_v10 = vmul.f32 %v3249_v58, %v1855_v1  ;;  %v2181_v1 = vld [vmem:[%s4226_s9 + $0x1d8] sm:$0xff] }
0x263e   :  { %v1863_v2 = vrot.slane %v1857_v10, 2 }
0x2640   :  { %1864 = vrot.lane.b32.xlu0 %v1863_v2, %s3293_s5  ;;  %v2178_v2 = vld [vmem:[%s4226_s9 + $0x1c0] sm:$0xff] }
0x26b2   :  { %v1865_v3 = vpop.permute.xlu0 %1864 }
0x26b3   :  { %3101 = vmatmul.mubr.msk.f32.vlgmr.msra.gmra.mxu1 %vm162_vm3, %v1865_v3  ;;  %v2180_v3 = vld [vmem:[%s4226_s9 + $0x1d0] sm:$0xff] }
0x26b4   :  { %2289 = vmatprep.mubr.f32.mxu1 %v3290_v7  ;;  %2729 = vmatpush1.msk.msra.mxu1 %vm2212_vm8, %v2182_v9  ;;  %v2122_v9 = vld [vmem:[%s4226_s9] sm:$0xff] }
0x26b5   :  { %2227 = vmatprep.subr.mxu1 %v2179_v63  ;;  %v2125_v63 = vld [vmem:[%s4226_s9 + $0x18] sm:$0xff] }
0x26b6   :  { %2228 = vmatpush1.msra.mxu1 %v2178_v2 }
0x2773   :  { %v1934_v4 = vpop.f32.mrf.mxu1 }
0x2774   :  { %v1939_v5 = vrot.slane %v1934_v4, 4 }
0x2775   :  { %v3102_v6 = vpop.f32.mrf.mxu1 }
0x2776   :  { %v1941_v13 = vadd.f32 %v1939_v5, %v3657_v12  ;;  %v2175_v5 = vld [vmem:[%s4226_s9 + $0x1a8] sm:$0xff]  ;;  %v2177_v6 = vld [vmem:[%s4226_s9 + $0x1b8] sm:$0xff] }
0x2777   :  { %2229 = vmatprep.subr.mxu1 %v2175_v5 }
0x2778   :  { %3252 = vtanh.f32 %v1941_v13  ;;  %v2725_v16 = vmul.f32 -1.442695, %v1941_v13  ;;  %v2174_v13 = vld [vmem:[%s4226_s9 + $0x1a0] sm:$0xff] }
0x2779   :  { %2230 = vmatpush1.msra.mxu1 %v2174_v13  ;;  %v2418_v13 = vld [vmem:[%s4228_s11 + $0x178] sm:$0xff] }
0x277a   :  { %3254 = vpow2.f32 %v2725_v16  ;;  %v2171_v16 = vld [vmem:[%s4226_s9 + $0x188] sm:$0xff] }
0x277b   :  { %2231 = vmatprep.subr.mxu1 %v2171_v16  ;;  %v2433_v16 = vld [vmem:[%s4228_s11 + $0x1f0] sm:$0xff] }
0x2785   :  { %v3253_v15 = vpop.eup %3252 }
0x2786   :  { %1954 = vrot.lane.b32.xlu1 %v3253_v15, %s3292_s24  ;;  %v2176_v15 = vld [vmem:[%s4226_s9 + $0x1b0] sm:$0xff] }
0x2787   :  { %v3255_v18 = vpop.eup %3254 }
0x2788   :  { %v1945_v20 = vadd.f32 1.0, %v3255_v18  ;;  %v2173_v18 = vld [vmem:[%s4226_s9 + $0x198] sm:$0xff] }
0x278a   :  { %3256 = vrcp.f32 %v1945_v20  ;;  %v2170_v20 = vld [vmem:[%s4226_s9 + $0x180] sm:$0xff] }
0x278b   :  { %2232 = vmatpush1.msra.mxu1 %v2170_v20  ;;  %v2417_v20 = vld [vmem:[%s4228_s11 + $0x170] sm:$0xff] }
0x2797   :  { %v3257_v22 = vpop.eup %3256 }
0x2798   :  { %v1952_v26 = vmul.f32 %v3257_v22, %v1950_v25 }
0x27f8   :  { %v1955_v23 = vpop.permute.xlu1 %1954 }
0x27f9   :  { %v1957_v24 = vmul.f32 %v3257_v22, %v1955_v23  ;;  %v2172_v23 = vld [vmem:[%s4226_s9 + $0x190] sm:$0xff] }
0x27fb   :  { %1959 = vrot.lane.b32.xlu0 %v1957_v24, %s3293_s5  ;;  %v2167_v24 = vld [vmem:[%s4226_s9 + $0x168] sm:$0xff] }
0x27fc   :  { %2233 = vmatprep.subr.mxu1 %v2167_v24  ;;  %v2384_v24 = vld [vmem:[%s4228_s11 + $0x68] sm:$0xff] }
0x286d   :  { %v1960_v27 = vpop.permute.xlu0 %1959 }
0x286e   :  { %v1962_v28 = vadd.f32 %v1960_v27, %v1952_v26  ;;  %v2169_v26 = vld [vmem:[%s4226_s9 + $0x178] sm:$0xff]  ;;  %v2166_v27 = vld [vmem:[%s4226_s9 + $0x160] sm:$0xff] }
0x286f   :  { %2234 = vmatpush1.msra.mxu1 %v2166_v27  ;;  %v2431_v27 = vld [vmem:[%s4228_s11 + $0x1e0] sm:$0xff] }
0x2870   :  { %3258 = vtanh.f32 %v1962_v28 }
0x287d   :  { %v3259_v29 = vpop.eup %3258 }
0x287e   :  { %1965 = vrot.lane.b32.xlu1 %v3259_v29, %s3292_s24  ;;  %v2163_v29 = vld [vmem:[%s4226_s9 + $0x148] sm:$0xff] }
0x287f   :  { %2235 = vmatprep.subr.mxu1 %v2163_v29  ;;  %v2415_v29 = vld [vmem:[%s4228_s11 + $0x160] sm:$0xff] }
0x28f0   :  { %v1966_v30 = vpop.permute.xlu1 %1965 }
0x28f1   :  { %v1968_v14 = vmul.f32 %v3257_v22, %v1966_v30  ;;  %v2165_v30 = vld [vmem:[%s4226_s9 + $0x158] sm:$0xff] }
0x28f3   :  { %v1974_v31 = vrot.slane %v1968_v14, 4 }
0x28f5   :  { %1975 = vrot.lane.b32.xlu0 %v1974_v31, %s3293_s5  ;;  %v2164_v31 = vld [vmem:[%s4226_s9 + $0x150] sm:$0xff] }
0x2967   :  { %v1976_v33 = vpop.permute.xlu0 %1975 }
0x2968   :  { %3112 = vmatmul.mubr.msk.f32.vlgmr.msra.gmra.mxu0 %vm162_vm3, %v1976_v33  ;;  %v2159_v33 = vld [vmem:[%s4226_s9 + $0x128] sm:$0xff] }
0x2969   :  { %2360 = vmatprep.mubr.f32.mxu0 %v3290_v7  ;;  %2732 = vmatpush1.msk.msra.mxu0 %vm2212_vm8, %v2184_v0  ;;  %v2124_v0 = vld [vmem:[%s4226_s9 + $0x10] sm:$0xff] }
0x296a   :  { %2298 = vmatprep.subr.mxu0 %v2181_v1  ;;  %v2402_v1 = vld [vmem:[%s4228_s11 + $0xf8] sm:$0xff] }
0x296b   :  { %2299 = vmatpush1.msra.mxu0 %v2180_v3 }
0x296c   :  { %2300 = vmatprep.subr.mxu0 %v2177_v6  ;;  %v2386_v6 = vld [vmem:[%s4228_s11 + $0x78] sm:$0xff] }
0x296d   :  { %2301 = vmatpush1.msra.mxu0 %v2176_v15  ;;  %v2401_v15 = vld [vmem:[%s4228_s11 + $0xf0] sm:$0xff] }
0x296e   :  { %2302 = vmatprep.subr.mxu0 %v2173_v18  ;;  %v2385_v18 = vld [vmem:[%s4228_s11 + $0x70] sm:$0xff] }
0x296f   :  { %2303 = vmatpush1.msra.mxu0 %v2172_v23  ;;  %v2432_v23 = vld [vmem:[%s4228_s11 + $0x1e8] sm:$0xff] }
0x2970   :  { %2304 = vmatprep.subr.mxu0 %v2169_v26  ;;  %v2399_v26 = vld [vmem:[%s4228_s11 + $0xe0] sm:$0xff] }
0x2a28   :  { %v2045_v34 = vpop.f32.mrf.mxu0 }
0x2a29   :  { %v2050_v35 = vrot.slane %v2045_v34, 2  ;;  %v2161_v34 = vld [vmem:[%s4226_s9 + $0x138] sm:$0xff] }
0x2a2a   :  { %v3113_v36 = vpop.f32.mrf.mxu0 }
0x2a2b   :  { %v2052_v21 = vadd.f32 %v2050_v35, %v3657_v12  ;;  %v2061_v12 = vrot.slane %v1962_v28, 6  ;;  %v2168_v28 = vld [vmem:[%s4226_s9 + $0x170] sm:$0xff]  ;;  %v2158_v35 = vld [vmem:[%s4226_s9 + $0x120] sm:$0xff] }
0x2a2c   :  { %2305 = vmatpush1.msra.mxu0 %v2168_v28  ;;  %v2160_v36 = vld [vmem:[%s4226_s9 + $0x130] sm:$0xff]  ;;  %v2383_v28 = vld [vmem:[%s4228_s11 + $0x60] sm:$0xff] }
0x2a2d   :  { %3260 = vtanh.f32 %v2052_v21  ;;  %v2727_v39 = vmul.f32 -1.442695, %v2052_v21  ;;  %2306 = vmatprep.subr.mxu0 %v2165_v30  ;;  %v2155_v21 = vld [vmem:[%s4226_s9 + $0x108] sm:$0xff]  ;;  %v2398_v30 = vld [vmem:[%s4228_s11 + $0xd8] sm:$0xff] }
0x2a2e   :  { %2307 = vmatpush1.msra.mxu0 %v2164_v31  ;;  %v2382_v31 = vld [vmem:[%s4228_s11 + $0x58] sm:$0xff] }
0x2a2f   :  { %3262 = vpow2.f32 %v2727_v39  ;;  %v2154_v39 = vld [vmem:[%s4226_s9 + $0x100] sm:$0xff]  ;;  %2308 = vmatprep.subr.mxu0 %v2161_v34  ;;  %v2397_v34 = vld [vmem:[%s4228_s11 + $0xd0] sm:$0xff] }
0x2a30   :  { %2309 = vmatpush1.msra.mxu0 %v2160_v36  ;;  %v2381_v36 = vld [vmem:[%s4228_s11 + $0x50] sm:$0xff] }
0x2a3a   :  { %v3261_v37 = vpop.eup %3260 }
0x2a3b   :  { %2065 = vrot.lane.b32.xlu1 %v3261_v37, %s3292_s24  ;;  %v2157_v37 = vld [vmem:[%s4226_s9 + $0x118] sm:$0xff] }
0x2a3c   :  { %v3263_v40 = vpop.eup %3262  ;;  %2310 = vmatprep.subr.mxu0 %v2157_v37  ;;  %v2396_v37 = vld [vmem:[%s4228_s11 + $0xc8] sm:$0xff] }
0x2a3d   :  { %v2056_v41 = vadd.f32 1.0, %v3263_v40  ;;  %v2156_v40 = vld [vmem:[%s4226_s9 + $0x110] sm:$0xff] }
0x2a3e   :  { %2311 = vmatpush1.msra.mxu0 %v2156_v40  ;;  %v2380_v40 = vld [vmem:[%s4228_s11 + $0x48] sm:$0xff] }
0x2a3f   :  { %3264 = vrcp.f32 %v2056_v41  ;;  %v2151_v41 = vld [vmem:[%s4226_s9 + $0xe8] sm:$0xff] }
0x2a4c   :  { %v3265_v42 = vpop.eup %3264 }
0x2a4d   :  { %v2063_v45 = vmul.f32 %v3265_v42, %v2061_v12  ;;  %v2147_v12 = vld [vmem:[%s4226_s9 + $0xc8] sm:$0xff] }
0x2aad   :  { %v2066_v43 = vpop.permute.xlu1 %2065 }
0x2aae   :  { %v2068_v44 = vmul.f32 %v3265_v42, %v2066_v43  ;;  %v2150_v43 = vld [vmem:[%s4226_s9 + $0xe0] sm:$0xff] }
0x2ab0   :  { %2070 = vrot.lane.b32.xlu0 %v2068_v44, %s3293_s5  ;;  %v2152_v44 = vld [vmem:[%s4226_s9 + $0xf0] sm:$0xff] }
0x2ab4   :  { %1532 = vrot.lane.b32.xlu0 %v3701_v11, %s3293_s5 }
0x2ab8   :  { %1859 = vrot.lane.b32.xlu0 %v1857_v10, %s3293_s5 }
0x2b22   :  { %v2071_v46 = vpop.permute.xlu0 %2070 }
0x2b23   :  { %v2073_v47 = vadd.f32 %v2071_v46, %v2063_v45  ;;  %v2149_v45 = vld [vmem:[%s4226_s9 + $0xd8] sm:$0xff]  ;;  %v2146_v46 = vld [vmem:[%s4226_s9 + $0xc0] sm:$0xff] }
0x2b25   :  { %3266 = vtanh.f32 %v2073_v47  ;;  %v2148_v47 = vld [vmem:[%s4226_s9 + $0xd0] sm:$0xff] }
0x2b26   :  { %v1533_v48 = vpop.permute.xlu0 %1532 }
0x2b27   :  { %1535 = vst.msk [vmem:[#allocation2] sm:$0x30] %vm567_vm7, %v1533_v48  ;;  %v2143_v48 = vld [vmem:[%s4226_s9 + $0xa8] sm:$0xff] }
0x2b2a   :  { %v1860_v49 = vpop.permute.xlu0 %1859 }
0x2b2b   :  { %1862 = vst.msk [vmem:[#allocation2 + $0x8] sm:$0xc] %vm455_vm5, %v1860_v49  ;;  %v2145_v49 = vld [vmem:[%s4226_s9 + $0xb8] sm:$0xff] }
0x2b2e   :  { %v2089_v56 = vld [vmem:[#allocation2 + $0x4] sm:$0x3] }
0x2b32   :  { %v3267_v19 = vpop.eup %3266  ;;  %v2099_v11 = vld [vmem:[#allocation2 + $0xa] sm:$0x3] }
0x2b33   :  { %2076 = vrot.lane.b32.xlu1 %v3267_v19, %s3292_s24  ;;  %v2100_v52 = vmax.f32 %v2098_v51, %v2099_v11  ;;  %v2142_v19 = vld [vmem:[%s4226_s9 + $0xa0] sm:$0xff]  ;;  %v2144_v11 = vld [vmem:[%s4226_s9 + $0xb0] sm:$0xff]  ;;  %v2139_v51 = vld [vmem:[%s4226_s9 + $0x88] sm:$0xff] }
0x2b37   :  { %1643 = vrot.lane.b32.xlu1 %v3720_v32, %s3293_s5 }
0x2b3b   :  { %1970 = vrot.lane.b32.xlu1 %v1968_v14, %s3293_s5  ;;  %v2162_v14 = vld [vmem:[%s4226_s9 + $0x140] sm:$0xff] }
0x2b3c   :  { %2236 = vmatpush1.msra.mxu1 %v2162_v14  ;;  %v2430_v14 = vld [vmem:[%s4228_s11 + $0x1d8] sm:$0xff] }
0x2b3d   :  { %2237 = vmatprep.subr.mxu1 %v2159_v33  ;;  %v2414_v33 = vld [vmem:[%s4228_s11 + $0x158] sm:$0xff] }
0x2b3e   :  { %2238 = vmatpush1.msra.mxu1 %v2158_v35  ;;  %v2429_v35 = vld [vmem:[%s4228_s11 + $0x1d0] sm:$0xff] }
0x2b3f   :  { %1421 = vrot.lane.b32.xlu1 %v3682_v50, %s3293_s5  ;;  %2239 = vmatprep.subr.mxu1 %v2155_v21  ;;  %v2413_v21 = vld [vmem:[%s4228_s11 + $0x150] sm:$0xff] }
0x2b40   :  { %2240 = vmatpush1.msra.mxu1 %v2154_v39  ;;  %v2428_v39 = vld [vmem:[%s4228_s11 + $0x1c8] sm:$0xff] }
0x2b41   :  { %2241 = vmatprep.subr.mxu1 %v2151_v41  ;;  %v2412_v41 = vld [vmem:[%s4228_s11 + $0x148] sm:$0xff] }
0x2b42   :  { %2242 = vmatpush1.msra.mxu1 %v2150_v43  ;;  %v2427_v43 = vld [vmem:[%s4228_s11 + $0x1c0] sm:$0xff] }
0x2b43   :  { %2102 = vrot.lane.b32.xlu1 %v2100_v52, %s3292_s24  ;;  %2243 = vmatprep.subr.mxu1 %v2147_v12  ;;  %v2141_v52 = vld [vmem:[%s4226_s9 + $0x98] sm:$0xff]  ;;  %v2411_v12 = vld [vmem:[%s4228_s11 + $0x140] sm:$0xff] }
0x2b44   :  { %2244 = vmatpush1.msra.mxu1 %v2146_v46  ;;  %v2426_v46 = vld [vmem:[%s4228_s11 + $0x1b8] sm:$0xff] }
0x2b45   :  { %2245 = vmatprep.subr.mxu1 %v2143_v48  ;;  %v2410_v48 = vld [vmem:[%s4228_s11 + $0x138] sm:$0xff] }
0x2b46   :  { %2246 = vmatpush1.msra.mxu1 %v2142_v19  ;;  %v2425_v19 = vld [vmem:[%s4228_s11 + $0x1b0] sm:$0xff] }
0x2b47   :  { %2247 = vmatprep.subr.mxu1 %v2139_v51  ;;  %v2409_v51 = vld [vmem:[%s4228_s11 + $0x130] sm:$0xff] }
0x2ba5   :  { %v2077_v53 = vpop.permute.xlu1 %2076 }
0x2ba6   :  { %v2079_v54 = vmul.f32 %v3265_v42, %v2077_v53  ;;  %v2153_v42 = vld [vmem:[%s4226_s9 + $0xf8] sm:$0xff]  ;;  %v2138_v53 = vld [vmem:[%s4226_s9 + $0x80] sm:$0xff] }
0x2ba7   :  { %2312 = vmatprep.subr.mxu0 %v2153_v42  ;;  %2248 = vmatpush1.msra.mxu1 %v2138_v53  ;;  %v2395_v42 = vld [vmem:[%s4228_s11 + $0xc0] sm:$0xff]  ;;  %v2424_v53 = vld [vmem:[%s4228_s11 + $0x1a8] sm:$0xff] }
0x2ba8   :  { %2081 = vrot.lane.b32.xlu0 %v2079_v54, %s3293_s5  ;;  %2313 = vmatpush1.msra.mxu0 %v2152_v44  ;;  %v2140_v54 = vld [vmem:[%s4226_s9 + $0x90] sm:$0xff]  ;;  %v2379_v44 = vld [vmem:[%s4228_s11 + $0x40] sm:$0xff] }
0x2ba9   :  { %v1644_v55 = vpop.permute.xlu1 %1643  ;;  %2314 = vmatprep.subr.mxu0 %v2149_v45  ;;  %v2394_v45 = vld [vmem:[%s4228_s11 + $0xb8] sm:$0xff] }
0x2baa   :  { %1646 = vst.msk [vmem:[#allocation2] sm:$0xc0] %vm679_vm6, %v1644_v55  ;;  %2315 = vmatpush1.msra.mxu0 %v2148_v47  ;;  %v2135_v55 = vld [vmem:[%s4226_s9 + $0x68] sm:$0xff]  ;;  %v2378_v47 = vld [vmem:[%s4228_s11 + $0x38] sm:$0xff] }
0x2bab   :  { %2316 = vmatprep.subr.mxu0 %v2145_v49  ;;  %2249 = vmatprep.subr.mxu1 %v2135_v55  ;;  %v2393_v49 = vld [vmem:[%s4228_s11 + $0xb0] sm:$0xff]  ;;  %v2408_v55 = vld [vmem:[%s4228_s11 + $0x128] sm:$0xff] }
0x2bac   :  { %2317 = vmatpush1.msra.mxu0 %v2144_v11  ;;  %v2377_v11 = vld [vmem:[%s4228_s11 + $0x30] sm:$0xff] }
0x2bad   :  { %v1971_v59 = vpop.permute.xlu1 %1970  ;;  %2318 = vmatprep.subr.mxu0 %v2141_v52  ;;  %v2392_v52 = vld [vmem:[%s4228_s11 + $0xa8] sm:$0xff] }
0x2bae   :  { %1973 = vst.msk [vmem:[#allocation2 + $0x8] sm:$0x30] %vm567_vm7, %v1971_v59  ;;  %v2137_v59 = vld [vmem:[%s4226_s9 + $0x78] sm:$0xff]  ;;  %2319 = vmatpush1.msra.mxu0 %v2140_v54  ;;  %v2376_v54 = vld [vmem:[%s4228_s11 + $0x28] sm:$0xff] }
0x2baf   :  { %2320 = vmatprep.subr.mxu0 %v2137_v59  ;;  %v2391_v59 = vld [vmem:[%s4228_s11 + $0xa0] sm:$0xff] }
0x2bb1   :  { %v1422_v32 = vpop.permute.xlu1 %1421  ;;  %v2090_v38 = vld [vmem:[#allocation2 + $0x6] sm:$0x3] }
0x2bb2   :  { %1424 = vst.msk [vmem:[#allocation2] sm:$0xc] %vm455_vm5, %v1422_v32  ;;  %v2091_v50 = vmax.f32 %v2089_v56, %v2090_v38  ;;  %v2134_v32 = vld [vmem:[%s4226_s9 + $0x60] sm:$0xff]  ;;  %v2136_v56 = vld [vmem:[%s4226_s9 + $0x70] sm:$0xff]  ;;  %v2131_v38 = vld [vmem:[%s4226_s9 + $0x48] sm:$0xff] }
0x2bb3   :  { %2250 = vmatpush1.msra.mxu1 %v2134_v32  ;;  %2321 = vmatpush1.msra.mxu0 %v2136_v56  ;;  %v2423_v32 = vld [vmem:[%s4228_s11 + $0x1a0] sm:$0xff] }
0x2bb4   :  { %2093 = vrot.lane.b32.xlu0 %v2091_v50, %s3293_s5  ;;  %v2133_v50 = vld [vmem:[%s4226_s9 + $0x58] sm:$0xff]  ;;  %2251 = vmatprep.subr.mxu1 %v2131_v38  ;;  %v2375_v56 = vld [vmem:[%s4228_s11 + $0x20] sm:$0xff] }
0x2bb5   :  { %v2107_v17 = vld [vmem:[#allocation2 + $0xc] sm:$0x3]  ;;  %v2103_v25 = vpop.permute.xlu1 %2102  ;;  %2322 = vmatprep.subr.mxu0 %v2133_v50  ;;  %v2407_v38 = vld [vmem:[%s4228_s11 + $0x120] sm:$0xff]  ;;  %v2390_v50 = vld [vmem:[%s4228_s11 + $0x98] sm:$0xff] }
0x2bb9   :  { %v2086_v57 = vld [vmem:[#allocation2 + $0x2] sm:$0x3] }
0x2bba   :  { %v2087_v58 = vmax.f32 %v2085_v60, %v2086_v57  ;;  %v2130_v60 = vld [vmem:[%s4226_s9 + $0x40] sm:$0xff]  ;;  %v2132_v57 = vld [vmem:[%s4226_s9 + $0x50] sm:$0xff] }
0x2bbb   :  { %2252 = vmatpush1.msra.mxu1 %v2130_v60  ;;  %2323 = vmatpush1.msra.mxu0 %v2132_v57  ;;  %v2422_v60 = vld [vmem:[%s4228_s11 + $0x198] sm:$0xff] }
0x2bbc   :  { %2088 = vst.msk [vmem:[#allocation3] sm:$0x3] %vm346_vm4, %v2087_v58  ;;  %v2127_v58 = vld [vmem:[%s4226_s9 + $0x28] sm:$0xff]  ;;  %v2374_v57 = vld [vmem:[%s4228_s11 + $0x18] sm:$0xff] }
0x2bbd   :  { %2253 = vmatprep.subr.mxu1 %v2127_v58  ;;  %v2406_v58 = vld [vmem:[%s4228_s11 + $0x118] sm:$0xff] }
0x2c1a   :  { %v2082_v61 = vpop.permute.xlu0 %2081 }
0x2c1b   :  { %2084 = vst.msk [vmem:[#allocation2 + $0x8] sm:$0xc0] %vm679_vm6, %v2082_v61  ;;  %v2129_v61 = vld [vmem:[%s4226_s9 + $0x38] sm:$0xff] }
0x2c1c   :  { %2324 = vmatprep.subr.mxu0 %v2129_v61  ;;  %v2389_v61 = vld [vmem:[%s4228_s11 + $0x90] sm:$0xff] }
0x2c1d   :  { %2325 = vmatpush1.msra.mxu0 %v2128_v62  ;;  %v2373_v62 = vld [vmem:[%s4228_s11 + $0x10] sm:$0xff] }
0x2c1e   :  { %2326 = vmatprep.subr.mxu0 %v2125_v63  ;;  %v2388_v63 = vld [vmem:[%s4228_s11 + $0x88] sm:$0xff] }
0x2c1f   :  { %2327 = vmatpush1.msra.mxu0 %v2124_v0  ;;  %v2372_v0 = vld [vmem:[%s4228_s11 + $0x8] sm:$0xff] }
0x2c22   :  { %v2108_v10 = vld [vmem:[#allocation2 + $0xe] sm:$0x3] }
0x2c23   :  { %v2109_v4 = vmax.f32 %v2107_v17, %v2108_v10  ;;  %v2126_v17 = vld [vmem:[%s4226_s9 + $0x20] sm:$0xff]  ;;  %v2434_v10 = vld [vmem:[%s4228_s11 + $0x1f8] sm:$0xff] }
0x2c24   :  { %2254 = vmatpush1.msra.mxu1 %v2126_v17  ;;  %2867 = vmatprep.subr.mxu0 %v2434_v10  ;;  %v2421_v17 = vld [vmem:[%s4228_s11 + $0x190] sm:$0xff]  ;;  %v2387_v10 = vld [vmem:[%s4228_s11 + $0x80] sm:$0xff] }
0x2c25   :  { %2111 = vrot.lane.b32.xlu0 %v2109_v4, %s3294_s2  ;;  %2255 = vmatprep.subr.mxu1 %v2123_v8  ;;  %v2405_v8 = vld [vmem:[%s4228_s11 + $0x110] sm:$0xff] }
0x2c26   :  { %v2094_v22 = vpop.permute.xlu0 %2093  ;;  %2256 = vmatpush1.msra.mxu1 %v2122_v9  ;;  %v2420_v9 = vld [vmem:[%s4228_s11 + $0x188] sm:$0xff] }
0x2c27   :  { %2097 = vst.msk [vmem:[#allocation3] sm:$0x3] %vm2096_vm9, %v2094_v22  ;;  %2832 = vmatprep.subr.mxu1 %v2402_v1  ;;  %v2400_v22 = vld [vmem:[%s4228_s11 + $0xe8] sm:$0xff] }
0x2c28   :  { %2106 = vst.msk [vmem:[#allocation3] sm:$0x3] %vm2105_vm10, %v2103_v25  ;;  %v2416_v25 = vld [vmem:[%s4228_s11 + $0x168] sm:$0xff] }
0x2c29   :  { %v2404_v1 = vld [vmem:[%s4228_s11 + $0x108] sm:$0xff] }
0x2c97   :  { %v2112_v2 = vpop.permute.xlu0 %2111 }
0x2c98   :  { %2115 = vst.msk [vmem:[#allocation3] sm:$0x3] %vm2114_vm11, %v2112_v2  ;;  %v2419_v2 = vld [vmem:[%s4228_s11 + $0x180] sm:$0xff] }
0x2c9f   :  { %v2116_v3 = vld [vmem:[#allocation3] sm:$0x3] }
0x2ca0   :  { %2118 = vrot.lane.b32.xlu1 %v2116_v3, %s3295_s30 }
0x2d12   :  { %v2119_v4 = vpop.permute.xlu1 %2118 }
0x2d13   :  { %v2121_v5 = vmax.f32 %v2116_v3, %v2119_v4  ;;  %v2371_v3 = vld [vmem:[%s4228_s11] sm:$0xff] }
0x2d14   :  { %v2403_v4 = vld [vmem:[%s4228_s11 + $0x100] sm:$0xff] }
0x2d15   :  { %2730 = vmatmul.mubr.msk.f32.vlgmr.msra.gmra.mxu1 %vm2208_vm12, %v2121_v5  ;;  %2733 = vmatmul.mubr.msk.f32.vlgmr.msra.gmra.mxu0 %vm2208_vm12, %v2121_v5  ;;  %v2188_v5 = vlaneseq }
0x2d16   :  { %2833 = vmatpush3.msra.mxu1 %v2386_v6  ;;  %2868 = vmatpush3.msra.mxu0 %v2418_v13 }
0x2d17   :  { %2834 = vmatprep.subr.mxu1 %v2401_v15  ;;  %2869 = vmatprep.subr.mxu0 %v2433_v16  ;;  %v2189_v6 = vshrl.u32 %v2188_v5, 7  ;;  %v2186_v16 = vld [vmem:[%s4227_s10] sm:$0xf] }
0x2d18   :  { %2835 = vmatpush3.msra.mxu1 %v2385_v18  ;;  %2870 = vmatpush3.msra.mxu0 %v2417_v20 }
0x2d19   :  { %2836 = vmatprep.subr.mxu1 %v2400_v22  ;;  %2871 = vmatprep.subr.mxu0 %v2432_v23  ;;  %v2190_v13 = vsub.s32 0, %v2189_v6  ;;  %v2198_v15 = vsub.s32 2, %v2189_v6  ;;  %v2194_v18 = vsub.s32 1, %v2189_v6  ;;  %v2202_v20 = vsub.s32 3, %v2189_v6 }
0x2d1a   :  { %2837 = vmatpush3.msra.mxu1 %v2384_v24  ;;  %2872 = vmatpush3.msra.mxu0 %v2416_v25 }
0x2d1b   :  { %2838 = vmatprep.subr.mxu1 %v2399_v26  ;;  %2873 = vmatprep.subr.mxu0 %v2431_v27  ;;  %v2191_v22 = vrot.slane %v2186_v16, %v2190_v13  ;;  %v2199_v23 = vrot.slane %v2186_v16, %v2198_v15  ;;  %v2195_v24 = vrot.slane %v2186_v16, %v2194_v18 }
0x2d1c   :  { %2839 = vmatpush3.msra.mxu1 %v2383_v28  ;;  %2874 = vmatpush3.msra.mxu0 %v2415_v29  ;;  %v2203_v25 = vrot.slane %v2186_v16, %v2202_v20 }
0x2d1d   :  { %2840 = vmatprep.subr.mxu1 %v2398_v30  ;;  %2875 = vmatprep.subr.mxu0 %v2430_v14 }
0x2d1e   :  { %2841 = vmatpush3.msra.mxu1 %v2382_v31  ;;  %2876 = vmatpush3.msra.mxu0 %v2414_v33 }
0x2d1f   :  { %2842 = vmatprep.subr.mxu1 %v2397_v34  ;;  %2877 = vmatprep.subr.mxu0 %v2429_v35 }
0x2d20   :  { %2843 = vmatpush3.msra.mxu1 %v2381_v36  ;;  %2878 = vmatpush3.msra.mxu0 %v2413_v21 }
0x2d21   :  { %2844 = vmatprep.subr.mxu1 %v2396_v37  ;;  %2879 = vmatprep.subr.mxu0 %v2428_v39  ;;  %v2590_v37 = vld [vmem:[%s4230_s13 + $0x38] sm:$0xff]  ;;  %v2589_v39 = vld [vmem:[%s4230_s13 + $0x30] sm:$0xff] }
0x2d22   :  { %2845 = vmatpush3.msra.mxu1 %v2380_v40  ;;  %2880 = vmatpush3.msra.mxu0 %v2412_v41  ;;  %v2588_v40 = vld [vmem:[%s4230_s13 + $0x28] sm:$0xff]  ;;  %v2587_v41 = vld [vmem:[%s4230_s13 + $0x20] sm:$0xff] }
0x2d23   :  { %2846 = vmatprep.subr.mxu1 %v2395_v42  ;;  %2881 = vmatprep.subr.mxu0 %v2427_v43  ;;  %v2586_v42 = vld [vmem:[%s4230_s13 + $0x18] sm:$0xff]  ;;  %v2585_v43 = vld [vmem:[%s4230_s13 + $0x10] sm:$0xff] }
0x2d24   :  { %2847 = vmatpush3.msra.mxu1 %v2379_v44  ;;  %2882 = vmatpush3.msra.mxu0 %v2411_v12  ;;  %v2584_v44 = vld [vmem:[%s4230_s13 + $0x8] sm:$0xff]  ;;  %v2583_v12 = vld [vmem:[%s4230_s13] sm:$0xff]  ;;  %s3296_s13 = smov [#allocation4]  }
0x2d25   :  { %2848 = vmatprep.subr.mxu1 %v2394_v45  ;;  %2883 = vmatprep.subr.mxu0 %v2426_v46  ;;  %s2680_s1 = sshll.u32 %s3296_s13, 4  ;;  %s2681_s1 = int_to_ptr.vmem [resolvable:$true] %s2680_s1 }
0x2d26   :  { %2849 = vmatpush3.msra.mxu1 %v2378_v47  ;;  %2884 = vmatpush3.msra.mxu0 %v2410_v48  ;;  %v2734_v47 = vld [vmem:[%s4229_s12] ss:$0 sm:$0xff]  ;;  %s3268_s12 = scalar_lea.vmem %s2681_s1, 32  ;;  %p3273_p1 = scmp.lt.s32.totalorder %s2681_s1, %s2681_s1 }
0x2d27   :  { %2850 = vmatprep.subr.mxu1 %v2393_v49  ;;  %2885 = vmatprep.subr.mxu0 %v2425_v19  ;;  %p3269_p0 = scmp.ne.s32.totalorder %s2681_s1, %s3268_s12  ;;  %p3274_p2 = scmp.lt.s32.totalorder %s3268_s12, %s3268_s12 }
0x2d28   :  { %2851 = vmatpush3.msra.mxu1 %v2377_v11  ;;  %2886 = vmatpush3.msra.mxu0 %v2409_v51 }
0x2d29   :  { %2852 = vmatprep.subr.mxu1 %v2392_v52  ;;  %2887 = vmatprep.subr.mxu0 %v2424_v53  ;;  %p3275_p3 = por %p3274_p2, %p3273_p1 }
0x2d2a   :  { %2853 = vmatpush3.msra.mxu1 %v2376_v54  ;;  %2888 = vmatpush3.msra.mxu0 %v2408_v55 }
0x2d2b   :  { %2854 = vmatprep.subr.mxu1 %v2391_v59  ;;  %2889 = vmatprep.subr.mxu0 %v2423_v32  ;;  %p3276_p4 = pnand %p3275_p3, %p3269_p0 }
0x2d2c   :  { %2855 = vmatpush3.msra.mxu1 %v2375_v56  ;;  %2890 = vmatpush3.msra.mxu0 %v2407_v38 }
0x2d2d   :  { %2856 = vmatprep.subr.mxu1 %v2390_v50  ;;  %2891 = vmatprep.subr.mxu0 %v2422_v60 }
0x2d2e   :  { %2857 = vmatpush3.msra.mxu1 %v2374_v57  ;;  %2892 = vmatpush3.msra.mxu0 %v2406_v58 }
0x2d2f   :  { %2858 = vmatprep.subr.mxu1 %v2389_v61  ;;  %2893 = vmatprep.subr.mxu0 %v2421_v17 }
0x2d30   :  { %2859 = vmatpush3.msra.mxu1 %v2373_v62  ;;  %2894 = vmatpush3.msra.mxu0 %v2405_v8 }
0x2d31   :  { %2860 = vmatprep.subr.mxu1 %v2388_v63  ;;  %2895 = vmatprep.subr.mxu0 %v2420_v9 }
0x2d32   :  { %2861 = vmatpush3.msra.mxu1 %v2372_v0  ;;  %2896 = vmatpush3.msra.mxu0 %v2404_v1 }
0x2d33   :  { %2862 = vmatprep.subr.mxu1 %v2387_v10  ;;  %2897 = vmatprep.subr.mxu0 %v2419_v2 }
0x2d34   :  { %2863 = vmatpush3.msra.mxu1 %v2371_v3  ;;  %2898 = vmatpush3.msra.mxu0 %v2403_v4 }
0x2d35   :  { %3114 = vmatprep.subr.mxu1 %v3290_v7 }
0x2dd5   :  { %v2291_v26 = vpop.f32.mrf.mxu1  ;;  %v2362_v27 = vpop.f32.mrf.mxu0 }
0x2dd6   :  { %v2292_v28 = vadd.f32 %v2291_v26, %v2191_v22  ;;  %v2363_v29 = vadd.f32 %v2362_v27, %v2199_v23 }
0x2dd7   :  { %v2293_v30 = vpop.f32.mrf.mxu1  ;;  %v2364_v14 = vpop.f32.mrf.mxu0 }
0x2dd8   :  { %v2294_v31 = vadd.f32 %v2293_v30, %v2195_v24  ;;  %v2365_v33 = vadd.f32 %v2364_v14, %v2203_v25  ;;  %v2367_v36 = vmax.f32 %v2292_v28, 0.0  ;;  %v2369_v21 = vmax.f32 %v2363_v29, 0.0 }
0x2dda   :  { %v2368_v34 = vmax.f32 %v2294_v31, 0.0  ;;  %v2370_v35 = vmax.f32 %v2365_v33, 0.0 }
0x2ddc   :  { %2506 = vmatprep.mubr.f32.mxu1 %v2368_v34  ;;  %2576 = vmatprep.mubr.f32.mxu0 %v2370_v35 }
0x2ddd   :  { %2507 = vmatmul.mubr.f32.vlgmr.msra.gmra.mxu1 %v2367_v36  ;;  %2577 = vmatmul.mubr.f32.vlgmr.msra.gmra.mxu0 %v2369_v21 }
0x2dde   :  { %3115 = vmatpush3.msra.mxu1 %v2590_v37  ;;  %3130 = vmatprep.mubr.msk.f32.mxu1 %vm3291_vm2, %v3290_v7 }
0x2ddf   :  { %3116 = vmatprep.subr.mxu1 %v3290_v7 }
0x2de0   :  { %3117 = vmatpush3.msra.mxu1 %v2589_v39 }
0x2de1   :  { %3118 = vmatprep.subr.mxu1 %v3290_v7 }
0x2de2   :  { %3119 = vmatpush3.msra.mxu1 %v2588_v40 }
0x2de3   :  { %3120 = vmatprep.subr.mxu1 %v3290_v7 }
0x2de4   :  { %3121 = vmatpush3.msra.mxu1 %v2587_v41 }
0x2de5   :  { %3122 = vmatprep.subr.mxu1 %v3290_v7 }
0x2de6   :  { %3123 = vmatpush3.msra.mxu1 %v2586_v42 }
0x2de7   :  { %3124 = vmatprep.subr.mxu1 %v3290_v7 }
0x2de8   :  { %3125 = vmatpush3.msra.mxu1 %v2585_v43 }
0x2de9   :  { %3126 = vmatprep.subr.mxu1 %v3290_v7 }
0x2dea   :  { %3127 = vmatpush3.msra.mxu1 %v2584_v44 }
0x2deb   :  { %3128 = vmatprep.subr.mxu1 %v3290_v7  ;;  %v2735_v7 = vld [vmem:[%s4231_s14] ss:$0 sm:$0xff] }
0x2dec   :  { %3129 = vmatpush3.msra.mxu1 %v2583_v12 }
0x2e9d   :  { %v2864_v45 = vpop.f32.mrf.mxu1  ;;  %v2899_v46 = vpop.f32.mrf.mxu0 }
0x2e9f   :  { %v2865_v48 = vpop.f32.mrf.mxu1  ;;  %v2900_v49 = vpop.f32.mrf.mxu0 }
0x2ea0   :  { %v2866_v19 = vadd.f32 %v2865_v48, %v2864_v45  ;;  %v2901_v51 = vadd.f32 %v2900_v49, %v2899_v46 }
0x2ea2   :  { %v2509_v11 = vadd.f32 %v2866_v19, %v2734_v47 }
0x2ea4   :  { %v2579_v52 = vadd.f32 %v2901_v51, %v2509_v11 }
0x2ea6   :  { %v2582_v53 = vmax.f32 %v2579_v52, 0.0 }
0x2ea8   :  { %3131 = vmatmul.mubr.msk.f32.vlgmr.msra.gmra.mxu1 %vm2598_vm13, %v2582_v53 }
0x2f68   :  { %v2668_v54 = vpop.f32.mrf.mxu1 }
0x2f69   :  { %v2669_v55 = vadd.f32 %v2735_v7, %v2668_v54 }
0x2f6a   :  { %v3132_v59 = vpop.f32.mrf.mxu1 }
0x2f6b   :  { %2673 = vst.msk [vmem:[#allocation4] sm:$0x3] %vm2672_vm14, %v2669_v55 }
0x2f6c   :  { %3279 = shalt.err (!%p3276_p4)
}
0x2f6d   :  { %2683 = dma.vmem_to_hbm [thread:$0]  %s2681_s1, 32, %s4232_s15, [#allocation5]  }
0x2f6e   :  { %3288 = dma.done.wait [#allocation5], 32  }
0x2f6f   :  { %3289 = vsyncadd [#allocation5], 4294967264 }
0x2f70   :  { %2687 = vsyncpa [#allocation5], 1 }

</bundles_post_ra>
